<compile_context>
chip_gen: v5e
topology: v5e:2x2
jax: 0.10.0
libtpu: 0.0.40
codegen_flags: <defaults>
</compile_context>

<pallas_src>
import functools

import jax
import jax.numpy as jnp
from jax.experimental import pallas as pl
from jax.experimental.pallas import tpu as pltpu

LANE = 128
SUBLANE = 8


def _round_up(n, m):
    return ((n + m - 1) // m) * m


def lstm_kernel(x_ref, w_ih_ref, w_hh_ref, b_ref, fc_w_ref, fc_b_ref,
                out_ref, gx_ref):
    T, Bp, I = x_ref.shape
    Hp4 = w_hh_ref.shape[1]
    Hp = Hp4 // 4

    w_hh = w_hh_ref[...]          # (Hp, 4Hp) bf16, g-gate columns pre-scaled x2
    b = b_ref[...]                # (1, 4Hp)  f32,  g-gate columns pre-scaled x2

    if I == 1:
        # K=1 contraction -> per-step VPU mul-add; skip the MXU and the scratch.
        w_ih_row = w_ih_ref[...]  # (1, 4Hp) f32 (VPU path; v5e has no bf16 VPU)
    else:
        # Hoisted input projection, stored in VMEM scratch instead of being
        # kept live as SSA vreg values across the unrolled recurrence.
        x_bf = x_ref[...].astype(jnp.bfloat16).reshape(T * Bp, I)
        w_ih_bf = w_ih_ref[...].astype(jnp.bfloat16)
        gx_ref[...] = (jnp.dot(x_bf, w_ih_bf,
                               preferred_element_type=jnp.float32)
                       + b).reshape(T, Bp, Hp4)

    h = jnp.zeros((Bp, Hp), jnp.float32)
    c = jnp.zeros((Bp, Hp), jnp.float32)

    # Statically unrolled recurrence: only h @ W_hh + elementwise gates sit on
    # the serial per-step critical path.  W_hh is loop-invariant so the RHS
    # push can stay resident in the MXU weight registers across the T steps.
    # TODO(synk): if a bundle dump shows the RHS push is NOT hoisted, drive the
    # MXU explicitly with pltpu.matmul_push_rhs / matmul_acc_lhs / matmul_pop.
    for t in range(T):
        if I == 1:
            gx_t = x_ref[t] * w_ih_row + b                  # (Bp,1)*(1,4Hp) VPU
        else:
            gx_t = gx_ref[t]
        gates = gx_t + jnp.dot(h.astype(jnp.bfloat16), w_hh,
                               preferred_element_type=jnp.float32)
        # One contiguous sigmoid EUP stream over all 4 gates (lane-aligned
        # slices are free views).  g was pre-scaled x2: tanh(g) = 2*sig(2g)-1.
        s = jax.nn.sigmoid(gates)
        i_g = s[:, 0 * Hp:1 * Hp]
        f_g = s[:, 1 * Hp:2 * Hp]
        o_g = s[:, 2 * Hp:3 * Hp]
        g_g = 2.0 * s[:, 3 * Hp:4 * Hp] - 1.0
        c = f_g * c + i_g * g_g
        h = o_g * jnp.tanh(c)

    # Final fully-connected layer on the last hidden state.
    out_ref[...] = (jnp.dot(h.astype(jnp.bfloat16), fc_w_ref[...],
                            preferred_element_type=jnp.float32)
                    + fc_b_ref[...])


def init_lstm_params(w_ih, w_hh, b_ih, b_hh, fc_w, fc_b):
    """One-time repack of PyTorch-layout params (gate order i,f,g,o) into the
    padded, transposed, gate-reordered (i,f,o,g) kernel layout.  Call once at
    model init and reuse across forward calls (do NOT repack per call)."""
    H = w_hh.shape[1]
    O = fc_w.shape[0]
    Hp = _round_up(max(H, LANE), LANE)
    Op = _round_up(max(O, LANE), LANE)

    def reorder_pad_rows(w):                          # (4H, X) -> (4Hp, X)
        gi, gf, gg, go = jnp.split(w, 4, axis=0)
        parts = [jnp.pad(g, ((0, Hp - H), (0, 0))) for g in (gi, gf, go, gg)]
        return jnp.concatenate(parts, axis=0)

    w_ih_T = jnp.transpose(reorder_pad_rows(w_ih))                     # (I, 4Hp)
    w_hh_T = jnp.transpose(
        jnp.pad(reorder_pad_rows(w_hh), ((0, 0), (0, Hp - H))))        # (Hp, 4Hp)
    b_row = reorder_pad_rows((b_ih + b_hh)[:, None])[:, 0][None, :]    # (1, 4Hp)

    # Pre-scale the g-gate pre-activation by 2 (exact, power of two) so the
    # kernel computes tanh(g) = 2*sigmoid(2g) - 1 from one fused sigmoid pass.
    scale = jnp.concatenate(
        [jnp.ones((3 * Hp,), jnp.float32), jnp.full((Hp,), 2.0, jnp.float32)])
    w_ih_T = w_ih_T * scale[None, :]
    w_hh_T = w_hh_T * scale[None, :]
    b_row = b_row * scale[None, :]

    fc_w_T = jnp.pad(jnp.transpose(fc_w), ((0, Hp - H), (0, Op - O)))  # (Hp, Op)
    fc_b_row = jnp.pad(fc_b[None, :], ((0, 0), (0, Op - O)))           # (1, Op)

    # bf16 for the MXU matmul operands (f32 accumulate in-kernel); the
    # w_ih / bias VPU path stays f32 (v5e VPU/EUP have no bf16).
    params = (w_ih_T.astype(jnp.float32),
              w_hh_T.astype(jnp.bfloat16),
              b_row.astype(jnp.float32),
              fc_w_T.astype(jnp.bfloat16),
              fc_b_row.astype(jnp.float32))
    params = jax.block_until_ready(params)   # materialize the repack at init
    return params, O


@functools.partial(jax.jit, static_argnames=("out_features",))
def _lstm_forward(x, w_ih_T, w_hh_T, b_row, fc_w_T, fc_b_row, *, out_features):
    B, T, I = x.shape
    Hp4 = w_hh_T.shape[1]
    Op = fc_w_T.shape[1]
    Bp = _round_up(max(B, SUBLANE), SUBLANE)

    # TODO(synk): if the caller can produce x time-major (T, B, I) upstream,
    # drop this per-call transpose/pad.
    x_tm = jnp.transpose(x, (1, 0, 2))                    # (T, B, I)
    x_p = jnp.pad(x_tm, ((0, 0), (0, Bp - B), (0, 0)))    # (T, Bp, I)

    out_p = pl.pallas_call(
        lstm_kernel,
        out_shape=jax.ShapeDtypeStruct((Bp, Op), jnp.float32),
        in_specs=[pl.BlockSpec(memory_space=pltpu.MemorySpace.VMEM)] * 6,
        out_specs=pl.BlockSpec(memory_space=pltpu.MemorySpace.VMEM),
        scratch_shapes=[pltpu.VMEM((T, Bp, Hp4), jnp.float32)],  # gates_x scratch
    )(x_p, w_ih_T, w_hh_T, b_row, fc_w_T, fc_b_row)
    # TODO(synk): add a batch grid axis (dimension_semantics=("parallel",...))
    # if B grows (lights up v7x's 2nd TensorCore), and a T grid with h/c carried
    # in scratch before T*Bp*4Hp approaches v7x's 32 MiB scoped-VMEM default.
    return out_p[:B, :out_features]


def lstm_forward(x, packed):
    params, out_features = packed
    return _lstm_forward(x, *params, out_features=out_features)


def lstm_reference(x, w_ih, w_hh, b_ih, b_hh, fc_w, fc_b):
    """Pure-JAX f32 reference mirroring PyTorch nn.LSTM (1 layer, batch_first) + fc."""
    B, T, I = x.shape
    H = w_hh.shape[1]
    h = jnp.zeros((B, H), jnp.float32)
    c = jnp.zeros((B, H), jnp.float32)
    for t in range(T):
        gates = x[:, t, :] @ w_ih.T + h @ w_hh.T + b_ih + b_hh
        i_g = jax.nn.sigmoid(gates[:, 0 * H:1 * H])
        f_g = jax.nn.sigmoid(gates[:, 1 * H:2 * H])
        g_g = jnp.tanh(gates[:, 2 * H:3 * H])
        o_g = jax.nn.sigmoid(gates[:, 3 * H:4 * H])
        c = f_g * c + i_g * g_g
        h = o_g * jnp.tanh(c)
    return h @ fc_w.T + fc_b


if __name__ == "__main__":
    # Shapes implied by the module: input_size=1, hidden_size=50, output_size=1.
    B, T, I, H, O = 2, 8, 1, 50, 1

    key = jax.random.PRNGKey(0)
    k = jax.random.split(key, 7)
    scale = 1.0 / jnp.sqrt(H)   # PyTorch default LSTM/Linear init range

    x = jax.random.normal(k[0], (B, T, I), dtype=jnp.float32)

    # PyTorch-layout parameters (gate order i, f, g, o along the 4H axis).
    w_ih = jax.random.uniform(k[1], (4 * H, I), jnp.float32, -scale, scale)
    w_hh = jax.random.uniform(k[2], (4 * H, H), jnp.float32, -scale, scale)
    b_ih = jax.random.uniform(k[3], (4 * H,), jnp.float32, -scale, scale)
    b_hh = jax.random.uniform(k[4], (4 * H,), jnp.float32, -scale, scale)
    fc_w = jax.random.uniform(k[5], (O, H), jnp.float32, -scale, scale)
    fc_b = jax.random.uniform(k[6], (O,), jnp.float32, -scale, scale)

    # One-time weight repack (cached); the forward only does transpose/pad of x.
    packed = init_lstm_params(w_ih, w_hh, b_ih, b_hh, fc_w, fc_b)

    out = lstm_forward(x, packed)
    out = jax.block_until_ready(out)

    ref = lstm_reference(x, w_ih, w_hh, b_ih, b_hh, fc_w, fc_b)
    assert out.shape == (B, O)
    # bf16 MXU operands (f32 accumulate / f32 gate math) -> loosened tolerance.
    assert jnp.allclose(out, ref, atol=2e-2, rtol=2e-2), (
        f"max abs diff = {jnp.max(jnp.abs(out - ref))}")

    print("KERNEL_OK")
</pallas_src>

<mosaic_0001>
module attributes {stable_mosaic.version = 11 : i64} {
  func.func @lstm_kernel(%arg0: memref<8x8x1xf32, #tpu.memory_space<vmem>>, %arg1: memref<1x512xf32, #tpu.memory_space<vmem>>, %arg2: memref<128x512xbf16, #tpu.memory_space<vmem>>, %arg3: memref<1x512xf32, #tpu.memory_space<vmem>>, %arg4: memref<128x128xbf16, #tpu.memory_space<vmem>>, %arg5: memref<1x128xf32, #tpu.memory_space<vmem>>, %arg6: memref<8x128xf32, #tpu.memory_space<vmem>>, %arg7: memref<8x8x512xf32, #tpu.memory_space<vmem>>) attributes {dimension_semantics = [], scalar_prefetch = 0 : i64, scratch_operands = 1 : i64, tpu.core_type = #tpu.core_type<tc>} {
    %c0 = arith.constant 0 : index
    %c0_0 = arith.constant 0 : index
    %0 = vector.load %arg2[%c0, %c0_0] : memref<128x512xbf16, #tpu.memory_space<vmem>>, vector<128x512xbf16>
    %c0_1 = arith.constant 0 : index
    %c0_2 = arith.constant 0 : index
    %1 = vector.load %arg3[%c0_1, %c0_2] : memref<1x512xf32, #tpu.memory_space<vmem>>, vector<1x512xf32>
    %c0_3 = arith.constant 0 : index
    %c0_4 = arith.constant 0 : index
    %2 = vector.load %arg1[%c0_3, %c0_4] : memref<1x512xf32, #tpu.memory_space<vmem>>, vector<1x512xf32>
    %cst = arith.constant 0.000000e+00 : f32
    %3 = vector.broadcast %cst : f32 to vector<8x128xf32>
    %cst_5 = arith.constant 0.000000e+00 : f32
    %4 = vector.broadcast %cst_5 : f32 to vector<8x128xf32>
    %c0_6 = arith.constant 0 : index
    %c0_7 = arith.constant 0 : index
    %c0_8 = arith.constant 0 : index
    %5 = vector.load %arg0[%c0_6, %c0_7, %c0_8] : memref<8x8x1xf32, #tpu.memory_space<vmem>>, vector<1x8x1xf32>
    %6 = vector.shape_cast %5 : vector<1x8x1xf32> to vector<8x1xf32>
    %7 = vector.broadcast %6 : vector<8x1xf32> to vector<8x512xf32>
    %8 = vector.broadcast %2 : vector<1x512xf32> to vector<8x512xf32>
    %9 = arith.mulf %7, %8 : vector<8x512xf32>
    %10 = vector.broadcast %1 : vector<1x512xf32> to vector<8x512xf32>
    %11 = arith.addf %9, %10 : vector<8x512xf32>
    %12 = arith.truncf %3 : vector<8x128xf32> to vector<8x128xbf16>
    %cst_9 = arith.constant dense<0.000000e+00> : vector<8x512xf32>
    %13 = tpu.matmul %12, %0, %cst_9 {dimension_numbers = #tpu.dot_dimension_numbers<[1], [0], [0], [1], [0, 0, 1, 1], [], []>} : vector<8x128xbf16>, vector<128x512xbf16>, vector<8x512xf32> -> vector<8x512xf32>
    %14 = arith.addf %11, %13 : vector<8x512xf32>
    %15 = arith.negf %14 : vector<8x512xf32>
    %16 = math.exp %15 : vector<8x512xf32>
    %cst_10 = arith.constant 1.000000e+00 : f32
    %17 = vector.broadcast %cst_10 : f32 to vector<8x512xf32>
    %18 = arith.addf %17, %16 : vector<8x512xf32>
    %19 = arith.divf %17, %18 : vector<8x512xf32>
    %20 = vector.extract_strided_slice %19 {offsets = [0, 0], sizes = [8, 128], strides = [1, 1]} : vector<8x512xf32> to vector<8x128xf32>
    %21 = vector.extract_strided_slice %19 {offsets = [0, 128], sizes = [8, 128], strides = [1, 1]} : vector<8x512xf32> to vector<8x128xf32>
    %22 = vector.extract_strided_slice %19 {offsets = [0, 256], sizes = [8, 128], strides = [1, 1]} : vector<8x512xf32> to vector<8x128xf32>
    %23 = vector.extract_strided_slice %19 {offsets = [0, 384], sizes = [8, 128], strides = [1, 1]} : vector<8x512xf32> to vector<8x128xf32>
    %cst_11 = arith.constant 2.000000e+00 : f32
    %24 = vector.broadcast %cst_11 : f32 to vector<8x128xf32>
    %25 = arith.mulf %24, %23 : vector<8x128xf32>
    %cst_12 = arith.constant 1.000000e+00 : f32
    %26 = vector.broadcast %cst_12 : f32 to vector<8x128xf32>
    %27 = arith.subf %25, %26 : vector<8x128xf32>
    %28 = arith.mulf %21, %4 : vector<8x128xf32>
    %29 = arith.mulf %20, %27 : vector<8x128xf32>
    %30 = arith.addf %28, %29 : vector<8x128xf32>
    %31 = math.tanh %30 : vector<8x128xf32>
    %32 = arith.mulf %22, %31 : vector<8x128xf32>
    %c1 = arith.constant 1 : index
    %c0_13 = arith.constant 0 : index
    %c0_14 = arith.constant 0 : index
    %33 = vector.load %arg0[%c1, %c0_13, %c0_14] : memref<8x8x1xf32, #tpu.memory_space<vmem>>, vector<1x8x1xf32>
    %34 = vector.shape_cast %33 : vector<1x8x1xf32> to vector<8x1xf32>
    %35 = vector.broadcast %34 : vector<8x1xf32> to vector<8x512xf32>
    %36 = vector.broadcast %2 : vector<1x512xf32> to vector<8x512xf32>
    %37 = arith.mulf %35, %36 : vector<8x512xf32>
    %38 = vector.broadcast %1 : vector<1x512xf32> to vector<8x512xf32>
    %39 = arith.addf %37, %38 : vector<8x512xf32>
    %40 = arith.truncf %32 : vector<8x128xf32> to vector<8x128xbf16>
    %cst_15 = arith.constant dense<0.000000e+00> : vector<8x512xf32>
    %41 = tpu.matmul %40, %0, %cst_15 {dimension_numbers = #tpu.dot_dimension_numbers<[1], [0], [0], [1], [0, 0, 1, 1], [], []>} : vector<8x128xbf16>, vector<128x512xbf16>, vector<8x512xf32> -> vector<8x512xf32>
    %42 = arith.addf %39, %41 : vector<8x512xf32>
    %43 = arith.negf %42 : vector<8x512xf32>
    %44 = math.exp %43 : vector<8x512xf32>
    %cst_16 = arith.constant 1.000000e+00 : f32
    %45 = vector.broadcast %cst_16 : f32 to vector<8x512xf32>
    %46 = arith.addf %45, %44 : vector<8x512xf32>
    %47 = arith.divf %45, %46 : vector<8x512xf32>
    %48 = vector.extract_strided_slice %47 {offsets = [0, 0], sizes = [8, 128], strides = [1, 1]} : vector<8x512xf32> to vector<8x128xf32>
    %49 = vector.extract_strided_slice %47 {offsets = [0, 128], sizes = [8, 128], strides = [1, 1]} : vector<8x512xf32> to vector<8x128xf32>
    %50 = vector.extract_strided_slice %47 {offsets = [0, 256], sizes = [8, 128], strides = [1, 1]} : vector<8x512xf32> to vector<8x128xf32>
    %51 = vector.extract_strided_slice %47 {offsets = [0, 384], sizes = [8, 128], strides = [1, 1]} : vector<8x512xf32> to vector<8x128xf32>
    %cst_17 = arith.constant 2.000000e+00 : f32
    %52 = vector.broadcast %cst_17 : f32 to vector<8x128xf32>
    %53 = arith.mulf %52, %51 : vector<8x128xf32>
    %cst_18 = arith.constant 1.000000e+00 : f32
    %54 = vector.broadcast %cst_18 : f32 to vector<8x128xf32>
    %55 = arith.subf %53, %54 : vector<8x128xf32>
    %56 = arith.mulf %49, %30 : vector<8x128xf32>
    %57 = arith.mulf %48, %55 : vector<8x128xf32>
    %58 = arith.addf %56, %57 : vector<8x128xf32>
    %59 = math.tanh %58 : vector<8x128xf32>
    %60 = arith.mulf %50, %59 : vector<8x128xf32>
    %c2 = arith.constant 2 : index
    %c0_19 = arith.constant 0 : index
    %c0_20 = arith.constant 0 : index
    %61 = vector.load %arg0[%c2, %c0_19, %c0_20] : memref<8x8x1xf32, #tpu.memory_space<vmem>>, vector<1x8x1xf32>
    %62 = vector.shape_cast %61 : vector<1x8x1xf32> to vector<8x1xf32>
    %63 = vector.broadcast %62 : vector<8x1xf32> to vector<8x512xf32>
    %64 = vector.broadcast %2 : vector<1x512xf32> to vector<8x512xf32>
    %65 = arith.mulf %63, %64 : vector<8x512xf32>
    %66 = vector.broadcast %1 : vector<1x512xf32> to vector<8x512xf32>
    %67 = arith.addf %65, %66 : vector<8x512xf32>
    %68 = arith.truncf %60 : vector<8x128xf32> to vector<8x128xbf16>
    %cst_21 = arith.constant dense<0.000000e+00> : vector<8x512xf32>
    %69 = tpu.matmul %68, %0, %cst_21 {dimension_numbers = #tpu.dot_dimension_numbers<[1], [0], [0], [1], [0, 0, 1, 1], [], []>} : vector<8x128xbf16>, vector<128x512xbf16>, vector<8x512xf32> -> vector<8x512xf32>
    %70 = arith.addf %67, %69 : vector<8x512xf32>
    %71 = arith.negf %70 : vector<8x512xf32>
    %72 = math.exp %71 : vector<8x512xf32>
    %cst_22 = arith.constant 1.000000e+00 : f32
    %73 = vector.broadcast %cst_22 : f32 to vector<8x512xf32>
    %74 = arith.addf %73, %72 : vector<8x512xf32>
    %75 = arith.divf %73, %74 : vector<8x512xf32>
    %76 = vector.extract_strided_slice %75 {offsets = [0, 0], sizes = [8, 128], strides = [1, 1]} : vector<8x512xf32> to vector<8x128xf32>
    %77 = vector.extract_strided_slice %75 {offsets = [0, 128], sizes = [8, 128], strides = [1, 1]} : vector<8x512xf32> to vector<8x128xf32>
    %78 = vector.extract_strided_slice %75 {offsets = [0, 256], sizes = [8, 128], strides = [1, 1]} : vector<8x512xf32> to vector<8x128xf32>
    %79 = vector.extract_strided_slice %75 {offsets = [0, 384], sizes = [8, 128], strides = [1, 1]} : vector<8x512xf32> to vector<8x128xf32>
    %cst_23 = arith.constant 2.000000e+00 : f32
    %80 = vector.broadcast %cst_23 : f32 to vector<8x128xf32>
    %81 = arith.mulf %80, %79 : vector<8x128xf32>
    %cst_24 = arith.constant 1.000000e+00 : f32
    %82 = vector.broadcast %cst_24 : f32 to vector<8x128xf32>
    %83 = arith.subf %81, %82 : vector<8x128xf32>
    %84 = arith.mulf %77, %58 : vector<8x128xf32>
    %85 = arith.mulf %76, %83 : vector<8x128xf32>
    %86 = arith.addf %84, %85 : vector<8x128xf32>
    %87 = math.tanh %86 : vector<8x128xf32>
    %88 = arith.mulf %78, %87 : vector<8x128xf32>
    %c3 = arith.constant 3 : index
    %c0_25 = arith.constant 0 : index
    %c0_26 = arith.constant 0 : index
    %89 = vector.load %arg0[%c3, %c0_25, %c0_26] : memref<8x8x1xf32, #tpu.memory_space<vmem>>, vector<1x8x1xf32>
    %90 = vector.shape_cast %89 : vector<1x8x1xf32> to vector<8x1xf32>
    %91 = vector.broadcast %90 : vector<8x1xf32> to vector<8x512xf32>
    %92 = vector.broadcast %2 : vector<1x512xf32> to vector<8x512xf32>
    %93 = arith.mulf %91, %92 : vector<8x512xf32>
    %94 = vector.broadcast %1 : vector<1x512xf32> to vector<8x512xf32>
    %95 = arith.addf %93, %94 : vector<8x512xf32>
    %96 = arith.truncf %88 : vector<8x128xf32> to vector<8x128xbf16>
    %cst_27 = arith.constant dense<0.000000e+00> : vector<8x512xf32>
    %97 = tpu.matmul %96, %0, %cst_27 {dimension_numbers = #tpu.dot_dimension_numbers<[1], [0], [0], [1], [0, 0, 1, 1], [], []>} : vector<8x128xbf16>, vector<128x512xbf16>, vector<8x512xf32> -> vector<8x512xf32>
    %98 = arith.addf %95, %97 : vector<8x512xf32>
    %99 = arith.negf %98 : vector<8x512xf32>
    %100 = math.exp %99 : vector<8x512xf32>
    %cst_28 = arith.constant 1.000000e+00 : f32
    %101 = vector.broadcast %cst_28 : f32 to vector<8x512xf32>
    %102 = arith.addf %101, %100 : vector<8x512xf32>
    %103 = arith.divf %101, %102 : vector<8x512xf32>
    %104 = vector.extract_strided_slice %103 {offsets = [0, 0], sizes = [8, 128], strides = [1, 1]} : vector<8x512xf32> to vector<8x128xf32>
    %105 = vector.extract_strided_slice %103 {offsets = [0, 128], sizes = [8, 128], strides = [1, 1]} : vector<8x512xf32> to vector<8x128xf32>
    %106 = vector.extract_strided_slice %103 {offsets = [0, 256], sizes = [8, 128], strides = [1, 1]} : vector<8x512xf32> to vector<8x128xf32>
    %107 = vector.extract_strided_slice %103 {offsets = [0, 384], sizes = [8, 128], strides = [1, 1]} : vector<8x512xf32> to vector<8x128xf32>
    %cst_29 = arith.constant 2.000000e+00 : f32
    %108 = vector.broadcast %cst_29 : f32 to vector<8x128xf32>
    %109 = arith.mulf %108, %107 : vector<8x128xf32>
    %cst_30 = arith.constant 1.000000e+00 : f32
    %110 = vector.broadcast %cst_30 : f32 to vector<8x128xf32>
    %111 = arith.subf %109, %110 : vector<8x128xf32>
    %112 = arith.mulf %105, %86 : vector<8x128xf32>
    %113 = arith.mulf %104, %111 : vector<8x128xf32>
    %114 = arith.addf %112, %113 : vector<8x128xf32>
    %115 = math.tanh %114 : vector<8x128xf32>
    %116 = arith.mulf %106, %115 : vector<8x128xf32>
    %c4 = arith.constant 4 : index
    %c0_31 = arith.constant 0 : index
    %c0_32 = arith.constant 0 : index
    %117 = vector.load %arg0[%c4, %c0_31, %c0_32] : memref<8x8x1xf32, #tpu.memory_space<vmem>>, vector<1x8x1xf32>
    %118 = vector.shape_cast %117 : vector<1x8x1xf32> to vector<8x1xf32>
    %119 = vector.broadcast %118 : vector<8x1xf32> to vector<8x512xf32>
    %120 = vector.broadcast %2 : vector<1x512xf32> to vector<8x512xf32>
    %121 = arith.mulf %119, %120 : vector<8x512xf32>
    %122 = vector.broadcast %1 : vector<1x512xf32> to vector<8x512xf32>
    %123 = arith.addf %121, %122 : vector<8x512xf32>
    %124 = arith.truncf %116 : vector<8x128xf32> to vector<8x128xbf16>
    %cst_33 = arith.constant dense<0.000000e+00> : vector<8x512xf32>
    %125 = tpu.matmul %124, %0, %cst_33 {dimension_numbers = #tpu.dot_dimension_numbers<[1], [0], [0], [1], [0, 0, 1, 1], [], []>} : vector<8x128xbf16>, vector<128x512xbf16>, vector<8x512xf32> -> vector<8x512xf32>
    %126 = arith.addf %123, %125 : vector<8x512xf32>
    %127 = arith.negf %126 : vector<8x512xf32>
    %128 = math.exp %127 : vector<8x512xf32>
    %cst_34 = arith.constant 1.000000e+00 : f32
    %129 = vector.broadcast %cst_34 : f32 to vector<8x512xf32>
    %130 = arith.addf %129, %128 : vector<8x512xf32>
    %131 = arith.divf %129, %130 : vector<8x512xf32>
    %132 = vector.extract_strided_slice %131 {offsets = [0, 0], sizes = [8, 128], strides = [1, 1]} : vector<8x512xf32> to vector<8x128xf32>
    %133 = vector.extract_strided_slice %131 {offsets = [0, 128], sizes = [8, 128], strides = [1, 1]} : vector<8x512xf32> to vector<8x128xf32>
    %134 = vector.extract_strided_slice %131 {offsets = [0, 256], sizes = [8, 128], strides = [1, 1]} : vector<8x512xf32> to vector<8x128xf32>
    %135 = vector.extract_strided_slice %131 {offsets = [0, 384], sizes = [8, 128], strides = [1, 1]} : vector<8x512xf32> to vector<8x128xf32>
    %cst_35 = arith.constant 2.000000e+00 : f32
    %136 = vector.broadcast %cst_35 : f32 to vector<8x128xf32>
    %137 = arith.mulf %136, %135 : vector<8x128xf32>
    %cst_36 = arith.constant 1.000000e+00 : f32
    %138 = vector.broadcast %cst_36 : f32 to vector<8x128xf32>
    %139 = arith.subf %137, %138 : vector<8x128xf32>
    %140 = arith.mulf %133, %114 : vector<8x128xf32>
    %141 = arith.mulf %132, %139 : vector<8x128xf32>
    %142 = arith.addf %140, %141 : vector<8x128xf32>
    %143 = math.tanh %142 : vector<8x128xf32>
    %144 = arith.mulf %134, %143 : vector<8x128xf32>
    %c5 = arith.constant 5 : index
    %c0_37 = arith.constant 0 : index
    %c0_38 = arith.constant 0 : index
    %145 = vector.load %arg0[%c5, %c0_37, %c0_38] : memref<8x8x1xf32, #tpu.memory_space<vmem>>, vector<1x8x1xf32>
    %146 = vector.shape_cast %145 : vector<1x8x1xf32> to vector<8x1xf32>
    %147 = vector.broadcast %146 : vector<8x1xf32> to vector<8x512xf32>
    %148 = vector.broadcast %2 : vector<1x512xf32> to vector<8x512xf32>
    %149 = arith.mulf %147, %148 : vector<8x512xf32>
    %150 = vector.broadcast %1 : vector<1x512xf32> to vector<8x512xf32>
    %151 = arith.addf %149, %150 : vector<8x512xf32>
    %152 = arith.truncf %144 : vector<8x128xf32> to vector<8x128xbf16>
    %cst_39 = arith.constant dense<0.000000e+00> : vector<8x512xf32>
    %153 = tpu.matmul %152, %0, %cst_39 {dimension_numbers = #tpu.dot_dimension_numbers<[1], [0], [0], [1], [0, 0, 1, 1], [], []>} : vector<8x128xbf16>, vector<128x512xbf16>, vector<8x512xf32> -> vector<8x512xf32>
    %154 = arith.addf %151, %153 : vector<8x512xf32>
    %155 = arith.negf %154 : vector<8x512xf32>
    %156 = math.exp %155 : vector<8x512xf32>
    %cst_40 = arith.constant 1.000000e+00 : f32
    %157 = vector.broadcast %cst_40 : f32 to vector<8x512xf32>
    %158 = arith.addf %157, %156 : vector<8x512xf32>
    %159 = arith.divf %157, %158 : vector<8x512xf32>
    %160 = vector.extract_strided_slice %159 {offsets = [0, 0], sizes = [8, 128], strides = [1, 1]} : vector<8x512xf32> to vector<8x128xf32>
    %161 = vector.extract_strided_slice %159 {offsets = [0, 128], sizes = [8, 128], strides = [1, 1]} : vector<8x512xf32> to vector<8x128xf32>
    %162 = vector.extract_strided_slice %159 {offsets = [0, 256], sizes = [8, 128], strides = [1, 1]} : vector<8x512xf32> to vector<8x128xf32>
    %163 = vector.extract_strided_slice %159 {offsets = [0, 384], sizes = [8, 128], strides = [1, 1]} : vector<8x512xf32> to vector<8x128xf32>
    %cst_41 = arith.constant 2.000000e+00 : f32
    %164 = vector.broadcast %cst_41 : f32 to vector<8x128xf32>
    %165 = arith.mulf %164, %163 : vector<8x128xf32>
    %cst_42 = arith.constant 1.000000e+00 : f32
    %166 = vector.broadcast %cst_42 : f32 to vector<8x128xf32>
    %167 = arith.subf %165, %166 : vector<8x128xf32>
    %168 = arith.mulf %161, %142 : vector<8x128xf32>
    %169 = arith.mulf %160, %167 : vector<8x128xf32>
    %170 = arith.addf %168, %169 : vector<8x128xf32>
    %171 = math.tanh %170 : vector<8x128xf32>
    %172 = arith.mulf %162, %171 : vector<8x128xf32>
    %c6 = arith.constant 6 : index
    %c0_43 = arith.constant 0 : index
    %c0_44 = arith.constant 0 : index
    %173 = vector.load %arg0[%c6, %c0_43, %c0_44] : memref<8x8x1xf32, #tpu.memory_space<vmem>>, vector<1x8x1xf32>
    %174 = vector.shape_cast %173 : vector<1x8x1xf32> to vector<8x1xf32>
    %175 = vector.broadcast %174 : vector<8x1xf32> to vector<8x512xf32>
    %176 = vector.broadcast %2 : vector<1x512xf32> to vector<8x512xf32>
    %177 = arith.mulf %175, %176 : vector<8x512xf32>
    %178 = vector.broadcast %1 : vector<1x512xf32> to vector<8x512xf32>
    %179 = arith.addf %177, %178 : vector<8x512xf32>
    %180 = arith.truncf %172 : vector<8x128xf32> to vector<8x128xbf16>
    %cst_45 = arith.constant dense<0.000000e+00> : vector<8x512xf32>
    %181 = tpu.matmul %180, %0, %cst_45 {dimension_numbers = #tpu.dot_dimension_numbers<[1], [0], [0], [1], [0, 0, 1, 1], [], []>} : vector<8x128xbf16>, vector<128x512xbf16>, vector<8x512xf32> -> vector<8x512xf32>
    %182 = arith.addf %179, %181 : vector<8x512xf32>
    %183 = arith.negf %182 : vector<8x512xf32>
    %184 = math.exp %183 : vector<8x512xf32>
    %cst_46 = arith.constant 1.000000e+00 : f32
    %185 = vector.broadcast %cst_46 : f32 to vector<8x512xf32>
    %186 = arith.addf %185, %184 : vector<8x512xf32>
    %187 = arith.divf %185, %186 : vector<8x512xf32>
    %188 = vector.extract_strided_slice %187 {offsets = [0, 0], sizes = [8, 128], strides = [1, 1]} : vector<8x512xf32> to vector<8x128xf32>
    %189 = vector.extract_strided_slice %187 {offsets = [0, 128], sizes = [8, 128], strides = [1, 1]} : vector<8x512xf32> to vector<8x128xf32>
    %190 = vector.extract_strided_slice %187 {offsets = [0, 256], sizes = [8, 128], strides = [1, 1]} : vector<8x512xf32> to vector<8x128xf32>
    %191 = vector.extract_strided_slice %187 {offsets = [0, 384], sizes = [8, 128], strides = [1, 1]} : vector<8x512xf32> to vector<8x128xf32>
    %cst_47 = arith.constant 2.000000e+00 : f32
    %192 = vector.broadcast %cst_47 : f32 to vector<8x128xf32>
    %193 = arith.mulf %192, %191 : vector<8x128xf32>
    %cst_48 = arith.constant 1.000000e+00 : f32
    %194 = vector.broadcast %cst_48 : f32 to vector<8x128xf32>
    %195 = arith.subf %193, %194 : vector<8x128xf32>
    %196 = arith.mulf %189, %170 : vector<8x128xf32>
    %197 = arith.mulf %188, %195 : vector<8x128xf32>
    %198 = arith.addf %196, %197 : vector<8x128xf32>
    %199 = math.tanh %198 : vector<8x128xf32>
    %200 = arith.mulf %190, %199 : vector<8x128xf32>
    %c7 = arith.constant 7 : index
    %c0_49 = arith.constant 0 : index
    %c0_50 = arith.constant 0 : index
    %201 = vector.load %arg0[%c7, %c0_49, %c0_50] : memref<8x8x1xf32, #tpu.memory_space<vmem>>, vector<1x8x1xf32>
    %202 = vector.shape_cast %201 : vector<1x8x1xf32> to vector<8x1xf32>
    %203 = vector.broadcast %202 : vector<8x1xf32> to vector<8x512xf32>
    %204 = vector.broadcast %2 : vector<1x512xf32> to vector<8x512xf32>
    %205 = arith.mulf %203, %204 : vector<8x512xf32>
    %206 = vector.broadcast %1 : vector<1x512xf32> to vector<8x512xf32>
    %207 = arith.addf %205, %206 : vector<8x512xf32>
    %208 = arith.truncf %200 : vector<8x128xf32> to vector<8x128xbf16>
    %cst_51 = arith.constant dense<0.000000e+00> : vector<8x512xf32>
    %209 = tpu.matmul %208, %0, %cst_51 {dimension_numbers = #tpu.dot_dimension_numbers<[1], [0], [0], [1], [0, 0, 1, 1], [], []>} : vector<8x128xbf16>, vector<128x512xbf16>, vector<8x512xf32> -> vector<8x512xf32>
    %210 = arith.addf %207, %209 : vector<8x512xf32>
    %211 = arith.negf %210 : vector<8x512xf32>
    %212 = math.exp %211 : vector<8x512xf32>
    %cst_52 = arith.constant 1.000000e+00 : f32
    %213 = vector.broadcast %cst_52 : f32 to vector<8x512xf32>
    %214 = arith.addf %213, %212 : vector<8x512xf32>
    %215 = arith.divf %213, %214 : vector<8x512xf32>
    %216 = vector.extract_strided_slice %215 {offsets = [0, 0], sizes = [8, 128], strides = [1, 1]} : vector<8x512xf32> to vector<8x128xf32>
    %217 = vector.extract_strided_slice %215 {offsets = [0, 128], sizes = [8, 128], strides = [1, 1]} : vector<8x512xf32> to vector<8x128xf32>
    %218 = vector.extract_strided_slice %215 {offsets = [0, 256], sizes = [8, 128], strides = [1, 1]} : vector<8x512xf32> to vector<8x128xf32>
    %219 = vector.extract_strided_slice %215 {offsets = [0, 384], sizes = [8, 128], strides = [1, 1]} : vector<8x512xf32> to vector<8x128xf32>
    %cst_53 = arith.constant 2.000000e+00 : f32
    %220 = vector.broadcast %cst_53 : f32 to vector<8x128xf32>
    %221 = arith.mulf %220, %219 : vector<8x128xf32>
    %cst_54 = arith.constant 1.000000e+00 : f32
    %222 = vector.broadcast %cst_54 : f32 to vector<8x128xf32>
    %223 = arith.subf %221, %222 : vector<8x128xf32>
    %224 = arith.mulf %217, %198 : vector<8x128xf32>
    %225 = arith.mulf %216, %223 : vector<8x128xf32>
    %226 = arith.addf %224, %225 : vector<8x128xf32>
    %227 = math.tanh %226 : vector<8x128xf32>
    %228 = arith.mulf %218, %227 : vector<8x128xf32>
    %229 = arith.truncf %228 : vector<8x128xf32> to vector<8x128xbf16>
    %c0_55 = arith.constant 0 : index
    %c0_56 = arith.constant 0 : index
    %230 = vector.load %arg4[%c0_55, %c0_56] : memref<128x128xbf16, #tpu.memory_space<vmem>>, vector<128x128xbf16>
    %cst_57 = arith.constant dense<0.000000e+00> : vector<8x128xf32>
    %231 = tpu.matmul %229, %230, %cst_57 {dimension_numbers = #tpu.dot_dimension_numbers<[1], [0], [0], [1], [0, 0, 1, 1], [], []>} : vector<8x128xbf16>, vector<128x128xbf16>, vector<8x128xf32> -> vector<8x128xf32>
    %c0_58 = arith.constant 0 : index
    %c0_59 = arith.constant 0 : index
    %232 = vector.load %arg5[%c0_58, %c0_59] : memref<1x128xf32, #tpu.memory_space<vmem>>, vector<1x128xf32>
    %233 = vector.broadcast %232 : vector<1x128xf32> to vector<8x128xf32>
    %234 = arith.addf %231, %233 : vector<8x128xf32>
    %c0_60 = arith.constant 0 : index
    %c0_61 = arith.constant 0 : index
    %235 = vector.load %arg6[%c0_60, %c0_61] : memref<8x128xf32, #tpu.memory_space<vmem>>, vector<8x128xf32>
    tpu.vector_store %arg6[%c0_60, %c0_61], %234 {strides = array<i32>} : memref<8x128xf32, #tpu.memory_space<vmem>>, vector<8x128xf32>,
    return
  }
}

</mosaic_0001>

<bundles_post_ra>
// kernel: _lstm_forward.1
= control target key start
LH: loop header
LB: loop body
LE: loop exit
PB: predicated region body
PF: predicated region fallthrough
CT: control target
= control target key end

     0   :  { %11 = vsyncpa [#allocation4], 0  ;;  %s2003_s24 = smov [#allocation3]   ;;  %s2004_s26 = smov 256   ;;  %s2624_s0 = inlined_call_operand.vmem [shape: f32[8,8,1], index: 0, kind: input, shape index: {}]   ;;  %s2625_s1 = inlined_call_operand.vmem [shape: f32[1,512], index: 1, kind: input, shape index: {}]   ;;  %s2626_s2 = inlined_call_operand.hbm [shape: bf16[128,512], index: 2, kind: input, shape index: {}]   ;;  %s2627_s3 = inlined_call_operand.vmem [shape: f32[1,512], index: 3, kind: input, shape index: {}]   ;;  %s2628_s4 = inlined_call_operand.vmem [shape: bf16[128,128], index: 4, kind: input, shape index: {}]   ;;  %s2629_s5 = inlined_call_operand.vmem [shape: f32[1,128], index: 5, kind: input, shape index: {}]   ;;  %s2630_s6 = inlined_call_operand.vmem [shape: f32[8,128], index: 6, kind: output, shape index: {}]  }
   0x1   :  { %s20_s23 = sshll.u32 %s2626_s2, 4  ;;  %s22_s25 = sshll.u32 %s2003_s24, 4  ;;  %s21_s23 = int_to_ptr.hbm [resolvable:$true] %s20_s23  ;;  %s23_s25 = int_to_ptr.vmem [resolvable:$true] %s22_s25 }
   0x2   :  { %s2005_s27 = smov 16  }
   0x3   :  { %28 = dma.hbm_to_vmem [thread:$0]  %s21_s23, 4096, %s23_s25, [#allocation4], %s2004_s26, %s2004_s26, %s2005_s27  }
   0x4   :  { %2001 = dma.done.wait [#allocation4], 4096  }
   0x5   :  { %2002 = vsyncadd [#allocation4], 4294963200  ;;  %v2006_v0 = vmov 0   ;;  %v1692_v1 = vld [vmem:[#allocation3 + $0xe0] sm:$0xf] }
   0x6   :  { %1829 = vset.pattern.permute.xlu0 %v2006_v0  ;;  %1830 = vset.pattern.permute.xlu1 %v2006_v0  ;;  %v1815_v2 = vld [vmem:[#allocation3 + $0xec] sm:$0xf0]  ;;  %v1813_v3 = vld [vmem:[#allocation3 + $0xe4] sm:$0xf]  ;;  %v1694_v5 = vld [vmem:[#allocation3 + $0xf0] sm:$0xf0] }
   0x7   :  { %1831 = vset.pattern.permute.xlu2 %v2006_v0  ;;  %v2048_v4 = vor.u32 %v1815_v2, %v1692_v1  ;;  %v1700_v6 = vld [vmem:[#allocation3 + $0xe8] sm:$0xf]  ;;  %v1816_v7 = vld [vmem:[#allocation3 + $0xf4] sm:$0xf0]  ;;  %v2050_v8 = vor.u32 %v1813_v3, %v1694_v5  ;;  %v1814_v10 = vld [vmem:[#allocation3 + $0xec] sm:$0xf] }
   0x8   :  { %v2052_v9 = vor.u32 %v1816_v7, %v1700_v6  ;;  %v1702_v11 = vld [vmem:[#allocation3 + $0xf8] sm:$0xf0]  ;;  %v1676_v12 = vld [vmem:[#allocation3 + $0xc0] sm:$0xf]  ;;  %v1811_v14 = vld [vmem:[#allocation3 + $0xcc] sm:$0xf0] }
   0x9   :  { %266 = vmatpush.bf16.msra.mxu0 %v2048_v4  ;;  %v2055_v13 = vor.u32 %v1814_v10, %v1702_v11  ;;  %v1809_v15 = vld [vmem:[#allocation3 + $0xc4] sm:$0xf]  ;;  %v1678_v16 = vld [vmem:[#allocation3 + $0xd0] sm:$0xf0]  ;;  %279 = vmatpush.bf16.msra.mxu1 %v2050_v8  ;;  %v2059_v17 = vor.u32 %v1811_v14, %v1676_v12  ;;  %v1684_v19 = vld [vmem:[#allocation3 + $0xc8] sm:$0xf] }
   0xa   :  { %292 = vmatpush.bf16.msra.mxu2 %v2052_v9  ;;  %v2061_v18 = vor.u32 %v1809_v15, %v1678_v16  ;;  %v1812_v20 = vld [vmem:[#allocation3 + $0xd4] sm:$0xf0]  ;;  %v1810_v21 = vld [vmem:[#allocation3 + $0xcc] sm:$0xf]  ;;  %v1686_v23 = vld [vmem:[#allocation3 + $0xd8] sm:$0xf0] }
   0xb   :  { %305 = vmatpush.bf16.msra.mxu3 %v2055_v13  ;;  %v2064_v22 = vor.u32 %v1812_v20, %v1684_v19  ;;  %v1660_v24 = vld [vmem:[#allocation3 + $0xa0] sm:$0xf]  ;;  %v1807_v25 = vld [vmem:[#allocation3 + $0xac] sm:$0xf0]  ;;  %v2066_v26 = vor.u32 %v1810_v21, %v1686_v23  ;;  %v1805_v27 = vld [vmem:[#allocation3 + $0xa4] sm:$0xf] }
   0xc   :  { %v1662_v28 = vld [vmem:[#allocation3 + $0xb0] sm:$0xf0]  ;;  %v1668_v29 = vld [vmem:[#allocation3 + $0xa8] sm:$0xf]  ;;  %v2069_v30 = vor.u32 %v1807_v25, %v1660_v24  ;;  %v1808_v31 = vld [vmem:[#allocation3 + $0xb4] sm:$0xf0] }
   0xd   :  { %267 = vmatpush.bf16.msra.mxu0 %v2059_v17  ;;  %v1806_v32 = vld [vmem:[#allocation3 + $0xac] sm:$0xf]  ;;  %v1670_v33 = vld [vmem:[#allocation3 + $0xb8] sm:$0xf0]  ;;  %280 = vmatpush.bf16.msra.mxu1 %v2061_v18  ;;  %v2073_v34 = vor.u32 %v1805_v27, %v1662_v28  ;;  %v2075_v35 = vor.u32 %v1808_v31, %v1668_v29  ;;  %v1644_v36 = vld [vmem:[#allocation3 + $0x80] sm:$0xf] }
   0xe   :  { %293 = vmatpush.bf16.msra.mxu2 %v2064_v22  ;;  %v1803_v37 = vld [vmem:[#allocation3 + $0x8c] sm:$0xf0]  ;;  %v1801_v38 = vld [vmem:[#allocation3 + $0x84] sm:$0xf]  ;;  %v2078_v39 = vor.u32 %v1806_v32, %v1670_v33  ;;  %v1646_v40 = vld [vmem:[#allocation3 + $0x90] sm:$0xf0] }
   0xf   :  { %306 = vmatpush.bf16.msra.mxu3 %v2066_v26  ;;  %v1652_v41 = vld [vmem:[#allocation3 + $0x88] sm:$0xf]  ;;  %v1804_v42 = vld [vmem:[#allocation3 + $0x94] sm:$0xf0]  ;;  %v1802_v43 = vld [vmem:[#allocation3 + $0x8c] sm:$0xf]  ;;  %v2081_v45 = vor.u32 %v1803_v37, %v1644_v36  ;;  %v2085_v46 = vor.u32 %v1801_v38, %v1646_v40 }
  0x10   :  { %v1654_v44 = vld [vmem:[#allocation3 + $0x98] sm:$0xf0]  ;;  %v2087_v47 = vor.u32 %v1804_v42, %v1652_v41  ;;  %v1628_v48 = vld [vmem:[#allocation3 + $0x60] sm:$0xf]  ;;  %v1799_v49 = vld [vmem:[#allocation3 + $0x6c] sm:$0xf0] }
  0x11   :  { %268 = vmatpush.bf16.msra.mxu0 %v2069_v30  ;;  %281 = vmatpush.bf16.msra.mxu1 %v2073_v34  ;;  %v1797_v50 = vld [vmem:[#allocation3 + $0x64] sm:$0xf]  ;;  %v2090_v51 = vor.u32 %v1802_v43, %v1654_v44  ;;  %v1630_v52 = vld [vmem:[#allocation3 + $0x70] sm:$0xf0]  ;;  %v1636_v53 = vld [vmem:[#allocation3 + $0x68] sm:$0xf]  ;;  %v2093_v57 = vor.u32 %v1799_v49, %v1628_v48 }
  0x12   :  { %294 = vmatpush.bf16.msra.mxu2 %v2075_v35  ;;  %v1800_v54 = vld [vmem:[#allocation3 + $0x74] sm:$0xf0]  ;;  %v1798_v55 = vld [vmem:[#allocation3 + $0x6c] sm:$0xf]  ;;  %v1638_v56 = vld [vmem:[#allocation3 + $0x78] sm:$0xf0]  ;;  %v2097_v58 = vor.u32 %v1797_v50, %v1630_v52 }
  0x13   :  { %307 = vmatpush.bf16.msra.mxu3 %v2078_v39  ;;  %v2099_v59 = vor.u32 %v1800_v54, %v1636_v53  ;;  %v1612_v60 = vld [vmem:[#allocation3 + $0x40] sm:$0xf]  ;;  %v1795_v61 = vld [vmem:[#allocation3 + $0x4c] sm:$0xf0]  ;;  %v1793_v62 = vld [vmem:[#allocation3 + $0x44] sm:$0xf]  ;;  %v2102_v63 = vor.u32 %v1798_v55, %v1638_v56 }
  0x14   :  { %v1614_v1 = vld [vmem:[#allocation3 + $0x50] sm:$0xf0]  ;;  %v1620_v2 = vld [vmem:[#allocation3 + $0x48] sm:$0xf]  ;;  %v1796_v3 = vld [vmem:[#allocation3 + $0x54] sm:$0xf0]  ;;  %v2108_v10 = vor.u32 %v1795_v61, %v1612_v60 }
  0x15   :  { %269 = vmatpush.bf16.msra.mxu0 %v2081_v45  ;;  %282 = vmatpush.bf16.msra.mxu1 %v2085_v46  ;;  %v1794_v5 = vld [vmem:[#allocation3 + $0x4c] sm:$0xf]  ;;  %v1622_v6 = vld [vmem:[#allocation3 + $0x58] sm:$0xf0]  ;;  %v74_v7 = vld [vmem:[%s2624_s0] sm:$0xff]  ;;  %v2112_v11 = vor.u32 %v1793_v62, %v1614_v1  ;;  %v2114_v12 = vor.u32 %v1796_v3, %v1620_v2 }
  0x16   :  { %295 = vmatpush.bf16.msra.mxu2 %v2087_v47  ;;  %77 = vperm.xlu0 %1829, %v74_v7   ;;  %v1596_v14 = vld [vmem:[#allocation3 + $0x20] sm:$0xf]  ;;  %v1791_v15 = vld [vmem:[#allocation3 + $0x2c] sm:$0xf0]  ;;  %v1789_v16 = vld [vmem:[#allocation3 + $0x24] sm:$0xf]  ;;  %v2117_v19 = vor.u32 %v1794_v5, %v1622_v6 }
  0x17   :  { %308 = vmatpush.bf16.msra.mxu3 %v2090_v51  ;;  %v1598_v20 = vld [vmem:[#allocation3 + $0x30] sm:$0xf0]  ;;  %v1604_v21 = vld [vmem:[#allocation3 + $0x28] sm:$0xf]  ;;  %v1792_v23 = vld [vmem:[#allocation3 + $0x34] sm:$0xf0]  ;;  %v2120_v27 = vor.u32 %v1791_v15, %v1596_v14 }
  0x18   :  { %v1790_v24 = vld [vmem:[#allocation3 + $0x2c] sm:$0xf]  ;;  %v1606_v25 = vld [vmem:[#allocation3 + $0x38] sm:$0xf0]  ;;  %v1580_v28 = vld [vmem:[#allocation3] sm:$0xf]  ;;  %v2124_v29 = vor.u32 %v1789_v16, %v1598_v20  ;;  %v2126_v31 = vor.u32 %v1792_v23, %v1604_v21 }
  0x19   :  { %270 = vmatpush.bf16.msra.mxu0 %v2093_v57  ;;  %283 = vmatpush.bf16.msra.mxu1 %v2097_v58  ;;  %v1787_v32 = vld [vmem:[#allocation3 + $0xc] sm:$0xf0]  ;;  %v1785_v33 = vld [vmem:[#allocation3 + $0x4] sm:$0xf]  ;;  %v1711_v36 = vld [vmem:[%s2624_s0 + $0x8] sm:$0xff]  ;;  %v2132_v37 = vor.u32 %v1790_v24, %v1606_v25 }
  0x1a   :  { %296 = vmatpush.bf16.msra.mxu2 %v2099_v59  ;;  %v1582_v38 = vld [vmem:[#allocation3 + $0x10] sm:$0xf0]  ;;  %v1588_v40 = vld [vmem:[#allocation3 + $0x8] sm:$0xf]  ;;  %v1788_v41 = vld [vmem:[#allocation3 + $0x14] sm:$0xf0]  ;;  %v2135_v44 = vor.u32 %v1787_v32, %v1580_v28 }
  0x1b   :  { %309 = vmatpush.bf16.msra.mxu3 %v2102_v63  ;;  %v1786_v42 = vld [vmem:[#allocation3 + $0xc] sm:$0xf]  ;;  %v1590_v43 = vld [vmem:[#allocation3 + $0x18] sm:$0xf0]  ;;  %v2139_v48 = vor.u32 %v1785_v33, %v1582_v38  ;;  %v2141_v49 = vor.u32 %v1788_v41, %v1588_v40  ;;  %v1741_v52 = vld [vmem:[%s2624_s0 + $0x30] sm:$0xff] }
  0x1c   :  { %v2144_v50 = vor.u32 %v1786_v42, %v1590_v43  ;;  %v72_v54 = vld [vmem:[%s2627_s3] sm:$0xf] }
  0x1d   :  { %271 = vmatpush.bf16.msra.mxu0 %v2108_v10  ;;  %284 = vmatpush.bf16.msra.mxu1 %v2112_v11  ;;  %v2232_v61 = vperm.slane %v72_v54, 0  ;;  %v2235_v1 = vperm.slane %v72_v54, 1  ;;  %v2244_v15 = vperm.slane %v72_v54, 2  ;;  %v2247_v23 = vperm.slane %v72_v54, 3 }
  0x1e   :  { %297 = vmatpush.bf16.msra.mxu2 %v2114_v12  ;;  %409 = vperm.xlu0 %1829, %v1711_v36  }
  0x1f   :  { %310 = vmatpush.bf16.msra.mxu3 %v2117_v19  ;;  %2646 = vst [vmem:[#allocation7_spill] sm:$0xff] %v2232_v61 }
  0x20   :  { %2647 = vst [vmem:[#allocation8_spill] sm:$0xff] %v2235_v1 }
  0x21   :  { %272 = vmatpush.bf16.msra.mxu0 %v2120_v27  ;;  %285 = vmatpush.bf16.msra.mxu1 %v2124_v29  ;;  %2650 = vst [vmem:[#allocation11_spill] sm:$0xff] %v2244_v15 }
  0x22   :  { %298 = vmatpush.bf16.msra.mxu2 %v2126_v31  ;;  %2651 = vst [vmem:[#allocation12_spill] sm:$0xff] %v2247_v23 }
  0x23   :  { %311 = vmatpush.bf16.msra.mxu3 %v2132_v37 }
  0x25   :  { %273 = vmatpush.bf16.msra.mxu0 %v2135_v44  ;;  %286 = vmatpush.bf16.msra.mxu1 %v2139_v48 }
  0x26   :  { %299 = vmatpush.bf16.msra.mxu2 %v2141_v49  ;;  %1184 = vperm.xlu0 %1829, %v1741_v52  }
  0x27   :  { %312 = vmatpush.bf16.msra.mxu3 %v2144_v50 }
  0x28   :  { %274 = vmatmul.bf16.vlgmr.msra.gmra.mxu0 %v2006_v0  ;;  %287 = vmatmul.bf16.vlgmr.msra.gmra.mxu1 %v2006_v0 }
  0x29   :  { %421 = vmatpush.bf16.msrb.mxu0 %v2048_v4  ;;  %434 = vmatpush.bf16.msrb.mxu1 %v2050_v8 }
  0x2a   :  { %300 = vmatmul.bf16.vlgmr.msra.gmra.mxu2 %v2006_v0  ;;  %313 = vmatmul.bf16.vlgmr.msra.gmra.mxu3 %v2006_v0  ;;  %v73_v0 = vld [vmem:[%s2625_s1] sm:$0xf] }
  0x2b   :  { %447 = vmatpush.bf16.msrb.mxu2 %v2052_v9  ;;  %460 = vmatpush.bf16.msrb.mxu3 %v2055_v13  ;;  %v2224_v53 = vperm.slane %v73_v0, 0  ;;  %v2229_v55 = vperm.slane %v73_v0, 1  ;;  %v2237_v2 = vperm.slane %v73_v0, 2  ;;  %v2240_v5 = vperm.slane %v73_v0, 3 }
  0x2d   :  { %422 = vmatpush.bf16.msrb.mxu0 %v2059_v17  ;;  %435 = vmatpush.bf16.msrb.mxu1 %v2061_v18  ;;  %2645 = vst [vmem:[#allocation6_spill] sm:$0xff] %v2229_v55 }
  0x2e   :  { %2648 = vst [vmem:[#allocation9_spill] sm:$0xff] %v2237_v2 }
  0x2f   :  { %448 = vmatpush.bf16.msrb.mxu2 %v2064_v22  ;;  %461 = vmatpush.bf16.msrb.mxu3 %v2066_v26  ;;  %2649 = vst [vmem:[#allocation10_spill] sm:$0xff] %v2240_v5 }
  0x31   :  { %423 = vmatpush.bf16.msrb.mxu0 %v2069_v30  ;;  %436 = vmatpush.bf16.msrb.mxu1 %v2073_v34 }
  0x33   :  { %449 = vmatpush.bf16.msrb.mxu2 %v2075_v35  ;;  %462 = vmatpush.bf16.msrb.mxu3 %v2078_v39 }
  0x35   :  { %424 = vmatpush.bf16.msrb.mxu0 %v2081_v45  ;;  %437 = vmatpush.bf16.msrb.mxu1 %v2085_v46 }
  0x37   :  { %450 = vmatpush.bf16.msrb.mxu2 %v2087_v47  ;;  %463 = vmatpush.bf16.msrb.mxu3 %v2090_v51 }
  0x39   :  { %425 = vmatpush.bf16.msrb.mxu0 %v2093_v57  ;;  %438 = vmatpush.bf16.msrb.mxu1 %v2097_v58 }
  0x3b   :  { %451 = vmatpush.bf16.msrb.mxu2 %v2099_v59  ;;  %464 = vmatpush.bf16.msrb.mxu3 %v2102_v63 }
  0x3d   :  { %426 = vmatpush.bf16.msrb.mxu0 %v2108_v10  ;;  %439 = vmatpush.bf16.msrb.mxu1 %v2112_v11 }
  0x3f   :  { %452 = vmatpush.bf16.msrb.mxu2 %v2114_v12  ;;  %465 = vmatpush.bf16.msrb.mxu3 %v2117_v19 }
  0x41   :  { %427 = vmatpush.bf16.msrb.mxu0 %v2120_v27  ;;  %440 = vmatpush.bf16.msrb.mxu1 %v2124_v29 }
  0x43   :  { %453 = vmatpush.bf16.msrb.mxu2 %v2126_v31  ;;  %466 = vmatpush.bf16.msrb.mxu3 %v2132_v37 }
  0x45   :  { %428 = vmatpush.bf16.msrb.mxu0 %v2135_v44  ;;  %441 = vmatpush.bf16.msrb.mxu1 %v2139_v48 }
  0x47   :  { %454 = vmatpush.bf16.msrb.mxu2 %v2141_v49  ;;  %467 = vmatpush.bf16.msrb.mxu3 %v2144_v50 }
  0x49   :  { %576 = vmatpush.bf16.msra.mxu0 %v2048_v4  ;;  %589 = vmatpush.bf16.msra.mxu1 %v2050_v8 }
  0x4b   :  { %602 = vmatpush.bf16.msra.mxu2 %v2052_v9  ;;  %615 = vmatpush.bf16.msra.mxu3 %v2055_v13 }
  0x4d   :  { %577 = vmatpush.bf16.msra.mxu0 %v2059_v17  ;;  %590 = vmatpush.bf16.msra.mxu1 %v2061_v18 }
  0x4f   :  { %603 = vmatpush.bf16.msra.mxu2 %v2064_v22  ;;  %616 = vmatpush.bf16.msra.mxu3 %v2066_v26 }
  0x51   :  { %578 = vmatpush.bf16.msra.mxu0 %v2069_v30  ;;  %591 = vmatpush.bf16.msra.mxu1 %v2073_v34 }
  0x53   :  { %604 = vmatpush.bf16.msra.mxu2 %v2075_v35  ;;  %617 = vmatpush.bf16.msra.mxu3 %v2078_v39 }
  0x55   :  { %579 = vmatpush.bf16.msra.mxu0 %v2081_v45  ;;  %592 = vmatpush.bf16.msra.mxu1 %v2085_v46 }
  0x57   :  { %605 = vmatpush.bf16.msra.mxu2 %v2087_v47  ;;  %618 = vmatpush.bf16.msra.mxu3 %v2090_v51 }
  0x59   :  { %580 = vmatpush.bf16.msra.mxu0 %v2093_v57  ;;  %593 = vmatpush.bf16.msra.mxu1 %v2097_v58 }
  0x5b   :  { %606 = vmatpush.bf16.msra.mxu2 %v2099_v59  ;;  %619 = vmatpush.bf16.msra.mxu3 %v2102_v63 }
  0x5d   :  { %581 = vmatpush.bf16.msra.mxu0 %v2108_v10  ;;  %594 = vmatpush.bf16.msra.mxu1 %v2112_v11 }
  0x5f   :  { %607 = vmatpush.bf16.msra.mxu2 %v2114_v12  ;;  %620 = vmatpush.bf16.msra.mxu3 %v2117_v19 }
  0x61   :  { %582 = vmatpush.bf16.msra.mxu0 %v2120_v27  ;;  %595 = vmatpush.bf16.msra.mxu1 %v2124_v29 }
  0x63   :  { %608 = vmatpush.bf16.msra.mxu2 %v2126_v31  ;;  %621 = vmatpush.bf16.msra.mxu3 %v2132_v37 }
  0x65   :  { %583 = vmatpush.bf16.msra.mxu0 %v2135_v44  ;;  %596 = vmatpush.bf16.msra.mxu1 %v2139_v48 }
  0x67   :  { %609 = vmatpush.bf16.msra.mxu2 %v2141_v49  ;;  %622 = vmatpush.bf16.msra.mxu3 %v2144_v50 }
  0x88   :  { %v78_v56 = vpop.permute.xlu0 %77 }
  0x89   :  { %v89_v60 = vmul.f32 %v2224_v53, %v78_v56  ;;  %v90_v62 = vmul.f32 %v2229_v55, %v78_v56  ;;  %v91_v14 = vmul.f32 %v2237_v2, %v78_v56  ;;  %v92_v21 = vmul.f32 %v2240_v5, %v78_v56 }
  0x8b   :  { %v102_v3 = vadd.f32 %v2232_v61, %v89_v60  ;;  %v103_v6 = vadd.f32 %v2235_v1, %v90_v62  ;;  %v104_v32 = vadd.f32 %v2244_v15, %v91_v14  ;;  %v105_v33 = vadd.f32 %v2247_v23, %v92_v21 }
  0xa5   :  { %v275_v7 = vpop.f32.mrf.mxu0  ;;  %v288_v20 = vpop.f32.mrf.mxu1 }
  0xa6   :  { %v318_v16 = vadd.f32 %v275_v7, %v102_v3  ;;  %v319_v24 = vadd.f32 %v288_v20, %v103_v6 }
  0xa8   :  { %v1706_v25 = vmul.f32 -1.442695, %v318_v16  ;;  %v1707_v28 = vmul.f32 -1.442695, %v319_v24 }
  0xaa   :  { %1833 = vpow2.f32 %v1706_v25 }
  0xab   :  { %1835 = vpow2.f32 %v1707_v28 }
  0xad   :  { %v301_v36 = vpop.f32.mrf.mxu2  ;;  %v314_v40 = vpop.f32.mrf.mxu3 }
  0xae   :  { %v320_v38 = vadd.f32 %v301_v36, %v104_v32  ;;  %v277_v41 = vpop.f32.mrf.mxu0  ;;  %v321_v42 = vadd.f32 %v314_v40, %v105_v33  ;;  %v290_v43 = vpop.f32.mrf.mxu1 }
  0xb0   :  { %v1708_v52 = vmul.f32 -1.442695, %v320_v38  ;;  %v1834_v0 = vpop.eup %1833  ;;  %v1709_v56 = vmul.f32 -1.442695, %v321_v42 }
  0xb1   :  { %v1836_v54 = vpop.eup %1835  ;;  %v334_v60 = vadd.f32 1.0, %v1834_v0 }
  0xb2   :  { %1837 = vpow2.f32 %v1708_v52  ;;  %v335_v62 = vadd.f32 1.0, %v1836_v54 }
  0xb3   :  { %1839 = vpow2.f32 %v1709_v56  ;;  %vm343_vm3 = vweird.f32 %v334_v60 }
  0xb4   :  { %1841 = vrcp.f32 %v334_v60  ;;  %vm358_vm0 = vweird.f32 %v335_v62 }
  0xb5   :  { %1843 = vrcp.f32 %v335_v62  ;;  %v303_v3 = vpop.f32.mrf.mxu2  ;;  %v316_v6 = vpop.f32.mrf.mxu3 }
  0xb6   :  { %v362_v3 = vand.u32 2147483647, %v335_v62  ;;  %v364_v6 = vand.u32 2147483648, %v335_v62 }
  0xb8   :  { %v1838_v7 = vpop.eup %1837  ;;  %vm363_vm10 = vcmp.eq.f32.partialorder %v362_v3, 8.507059e+37  ;;  %v2656_v3 = vld [vmem:[#allocation8_spill] sm:$0xff] }
  0xb9   :  { %v1840_v14 = vpop.eup %1839  ;;  %v336_v24 = vadd.f32 1.0, %v1838_v7 }
  0xba   :  { %v1842_v16 = vpop.eup %1841  ;;  %v337_v20 = vadd.f32 1.0, %v1840_v14 }
  0xbb   :  { %v1844_v21 = vpop.eup %1843  ;;  %v339_v28 = vmul.f32 %v1842_v16, %v334_v60  ;;  %vm344_vm4 = vweird.f32 %v1842_v16  ;;  %vm373_vm13 = vweird.f32 %v336_v24 }
  0xbc   :  { %v354_v25 = vmul.f32 %v1844_v21, %v335_v62  ;;  %1845 = vrcp.f32 %v337_v20  ;;  %vm359_vm1 = vweird.f32 %v1844_v21  ;;  %v394_v52 = vand.u32 2147483648, %v337_v20  ;;  %vm345_vm9 = vmor %vm343_vm3, %vm344_vm4 }
  0xbd   :  { %1847 = vrcp.f32 %v336_v24  ;;  %v340_v33 = vsub.f32 1.0, %v339_v28  ;;  %v392_v54 = vand.u32 2147483647, %v337_v20  ;;  %vm2251_vm5 = vmor %vm358_vm0, %vm359_vm1  ;;  %vm388_vm6 = vweird.f32 %v337_v20 }
  0xbe   :  { %v355_v32 = vsub.f32 1.0, %v354_v25  ;;  %v365_v62 = vor.u32 1.1754944e-38, %v364_v6 }
  0xbf   :  { %v341_v42 = vmul.f32 %v1842_v16, %v340_v33  ;;  %v395_v33 = vor.u32 1.1754944e-38, %v394_v52  ;;  %vm393_vm8 = vcmp.eq.f32.partialorder %v392_v54, 8.507059e+37 }
  0xc0   :  { %v356_v38 = vmul.f32 %v1844_v21, %v355_v32  ;;  %v349_v32 = vand.u32 2147483648, %v334_v60 }
  0xc1   :  { %v342_v14 = vadd.f32 %v1842_v16, %v341_v42 }
  0xc2   :  { %v1846_v36 = vpop.eup %1845  ;;  %v357_v0 = vadd.f32 %v1844_v21, %v356_v38  ;;  %v350_v2 = vor.u32 1.1754944e-38, %v349_v32 }
  0xc3   :  { %v384_v40 = vmul.f32 %v1846_v36, %v337_v20  ;;  %v1848_v41 = vpop.eup %1847  ;;  %vm389_vm2 = vweird.f32 %v1846_v36  ;;  %v346_v15 = vsel %vm345_vm9, %v1842_v16, %v342_v14 }
  0xc4   :  { %v369_v7 = vmul.f32 %v1848_v41, %v336_v24  ;;  %vm390_vm7 = vmor %vm388_vm6, %vm389_vm2  ;;  %v361_v38 = vsel %vm2251_vm5, %v1844_v21, %v357_v0  ;;  %vm374_vm12 = vweird.f32 %v1848_v41 }
  0xc5   :  { %v385_v43 = vsub.f32 1.0, %v384_v40  ;;  %v347_v40 = vand.u32 2147483647, %v334_v60  ;;  %v379_v60 = vand.u32 2147483648, %v336_v24  ;;  %vm375_vm14 = vmor %vm373_vm13, %vm374_vm12 }
  0xc6   :  { %v370_v42 = vsub.f32 1.0, %v369_v7 }
  0xc7   :  { %v386_v56 = vmul.f32 %v1846_v36, %v385_v43  ;;  %vm348_vm11 = vcmp.eq.f32.partialorder %v347_v40, 8.507059e+37 }
  0xc8   :  { %v351_v1 = vsel %vm348_vm11, %v350_v2, %v346_v15  ;;  %v371_v52 = vmul.f32 %v1848_v41, %v370_v42 }
  0xc9   :  { %v387_v28 = vadd.f32 %v1846_v36, %v386_v56  ;;  %v366_v56 = vsel %vm363_vm10, %v365_v62, %v361_v38  ;;  %v2658_v38 = vld [vmem:[#allocation10_spill] sm:$0xff] }
  0xca   :  { %v400_v61 = vmul.f32 0.0, %v366_v56  ;;  %v372_v21 = vadd.f32 %v1848_v41, %v371_v52  ;;  %v2659_v56 = vld [vmem:[#allocation11_spill] sm:$0xff]  ;;  %v2660_v52 = vld [vmem:[#allocation12_spill] sm:$0xff] }
  0xcb   :  { %v391_v43 = vsel %vm390_vm7, %v1846_v36, %v387_v28  ;;  %v377_v36 = vand.u32 2147483647, %v336_v24  ;;  %v2655_v24 = vld [vmem:[#allocation7_spill] sm:$0xff] }
  0xcc   :  { %v396_v23 = vsel %vm393_vm8, %v395_v33, %v391_v43  ;;  %v376_v16 = vsel %vm375_vm14, %v1848_v41, %v372_v21  ;;  %v2657_v33 = vld [vmem:[#allocation9_spill] sm:$0xff] }
  0xcd   :  { %v398_v5 = vmul.f32 2.0, %v396_v23  ;;  %v380_v23 = vor.u32 1.1754944e-38, %v379_v60  ;;  %vm378_vm15 = vcmp.eq.f32.partialorder %v377_v36, 8.507059e+37 }
  0xcf   :  { %v1710_v20 = vadd.f32 -1.0, %v398_v5  ;;  %v381_v54 = vsel %vm378_vm15, %v380_v23, %v376_v16 }
  0xd1   :  { %v401_v55 = vmul.f32 %v1710_v20, %v351_v1  ;;  %v2654_v1 = vld [vmem:[#allocation6_spill] sm:$0xff] }
  0xd3   :  { %v2258_v25 = vadd.f32 %v401_v55, %v400_v61  ;;  %v410_v55 = vpop.permute.xlu0 %409 }
  0xd4   :  { %v412_v61 = vmul.f32 %v410_v55, %v2224_v53  ;;  %v413_v15 = vmul.f32 %v410_v55, %v2654_v1  ;;  %v414_v40 = vmul.f32 %v410_v55, %v2657_v33  ;;  %v415_v43 = vmul.f32 %v410_v55, %v2658_v38 }
  0xd5   :  { %1849 = vtanh.f32 %v2258_v25 }
  0xd6   :  { %v416_v41 = vadd.f32 %v412_v61, %v2655_v24  ;;  %v417_v6 = vadd.f32 %v413_v15, %v2656_v3  ;;  %v418_v20 = vadd.f32 %v414_v40, %v2659_v56  ;;  %v419_v21 = vadd.f32 %v415_v43, %v2660_v52 }
  0xdb   :  { %v1850_v0 = vpop.eup %1849 }
  0xdc   :  { %v404_v5 = vmul.f32 %v1850_v0, %v381_v54 }
  0xde   :  { %v420_v2 = vpack.c.bf16 %v404_v5, %v404_v5  ;;  %v1717_v5 = vld [vmem:[%s2624_s0 + $0x10] sm:$0xff] }
  0xdf   :  { %564 = vperm.xlu1 %1830, %v1717_v5  }
  0xe0   :  { %429 = vmatmul.bf16.vlgmr.msrb.gmra.mxu0 %v420_v2  ;;  %442 = vmatmul.bf16.vlgmr.msrb.gmra.mxu1 %v420_v2 }
  0xe1   :  { %455 = vmatmul.bf16.vlgmr.msrb.gmra.mxu2 %v420_v2  ;;  %468 = vmatmul.bf16.vlgmr.msrb.gmra.mxu3 %v420_v2 }
  0xe2   :  { %731 = vmatpush.bf16.msrb.mxu0 %v2048_v4  ;;  %744 = vmatpush.bf16.msrb.mxu1 %v2050_v8 }
  0xe3   :  { %757 = vmatpush.bf16.msrb.mxu2 %v2052_v9  ;;  %770 = vmatpush.bf16.msrb.mxu3 %v2055_v13 }
  0xe6   :  { %732 = vmatpush.bf16.msrb.mxu0 %v2059_v17  ;;  %745 = vmatpush.bf16.msrb.mxu1 %v2061_v18 }
  0xe7   :  { %758 = vmatpush.bf16.msrb.mxu2 %v2064_v22  ;;  %771 = vmatpush.bf16.msrb.mxu3 %v2066_v26 }
  0xea   :  { %733 = vmatpush.bf16.msrb.mxu0 %v2069_v30  ;;  %746 = vmatpush.bf16.msrb.mxu1 %v2073_v34 }
  0xeb   :  { %759 = vmatpush.bf16.msrb.mxu2 %v2075_v35  ;;  %772 = vmatpush.bf16.msrb.mxu3 %v2078_v39 }
  0xee   :  { %734 = vmatpush.bf16.msrb.mxu0 %v2081_v45  ;;  %747 = vmatpush.bf16.msrb.mxu1 %v2085_v46 }
  0xef   :  { %760 = vmatpush.bf16.msrb.mxu2 %v2087_v47  ;;  %773 = vmatpush.bf16.msrb.mxu3 %v2090_v51 }
  0xf2   :  { %735 = vmatpush.bf16.msrb.mxu0 %v2093_v57  ;;  %748 = vmatpush.bf16.msrb.mxu1 %v2097_v58 }
  0xf3   :  { %761 = vmatpush.bf16.msrb.mxu2 %v2099_v59  ;;  %774 = vmatpush.bf16.msrb.mxu3 %v2102_v63 }
  0xf6   :  { %736 = vmatpush.bf16.msrb.mxu0 %v2108_v10  ;;  %749 = vmatpush.bf16.msrb.mxu1 %v2112_v11 }
  0xf7   :  { %762 = vmatpush.bf16.msrb.mxu2 %v2114_v12  ;;  %775 = vmatpush.bf16.msrb.mxu3 %v2117_v19 }
  0xfa   :  { %737 = vmatpush.bf16.msrb.mxu0 %v2120_v27  ;;  %750 = vmatpush.bf16.msrb.mxu1 %v2124_v29 }
  0xfb   :  { %763 = vmatpush.bf16.msrb.mxu2 %v2126_v31  ;;  %776 = vmatpush.bf16.msrb.mxu3 %v2132_v37 }
  0xfe   :  { %738 = vmatpush.bf16.msrb.mxu0 %v2135_v44  ;;  %751 = vmatpush.bf16.msrb.mxu1 %v2139_v48 }
  0xff   :  { %764 = vmatpush.bf16.msrb.mxu2 %v2141_v49  ;;  %777 = vmatpush.bf16.msrb.mxu3 %v2144_v50 }
 0x15d   :  { %v430_v7 = vpop.f32.mrf.mxu0  ;;  %v443_v14 = vpop.f32.mrf.mxu1 }
 0x15e   :  { %v473_v28 = vadd.f32 %v430_v7, %v416_v41  ;;  %v474_v32 = vadd.f32 %v443_v14, %v417_v6 }
 0x160   :  { %v1712_v62 = vmul.f32 -1.442695, %v473_v28  ;;  %v1713_v42 = vmul.f32 -1.442695, %v474_v32 }
 0x162   :  { %1851 = vpow2.f32 %v1712_v62 }
 0x163   :  { %1853 = vpow2.f32 %v1713_v42 }
 0x164   :  { %v456_v60 = vpop.f32.mrf.mxu2  ;;  %v469_v36 = vpop.f32.mrf.mxu3 }
 0x165   :  { %v475_v16 = vadd.f32 %v456_v60, %v418_v20  ;;  %v476_v23 = vadd.f32 %v469_v36, %v419_v21  ;;  %v432_v0 = vpop.f32.mrf.mxu0  ;;  %v445_v54 = vpop.f32.mrf.mxu1 }
 0x167   :  { %v1714_v2 = vmul.f32 -1.442695, %v475_v16  ;;  %v1715_v55 = vmul.f32 -1.442695, %v476_v23  ;;  %v1723_v16 = vld [vmem:[%s2624_s0 + $0x18] sm:$0xff] }
 0x168   :  { %v1852_v61 = vpop.eup %1851  ;;  %719 = vperm.xlu1 %1830, %v1723_v16  }
 0x169   :  { %v1854_v15 = vpop.eup %1853  ;;  %v2304_v41 = vadd.f32 1.0, %v1852_v61  ;;  %1855 = vpow2.f32 %v1714_v2 }
 0x16a   :  { %v490_v6 = vadd.f32 1.0, %v1854_v15  ;;  %1857 = vpow2.f32 %v1715_v55 }
 0x16b   :  { %1859 = vrcp.f32 %v2304_v41  ;;  %vm498_vm6 = vweird.f32 %v2304_v41 }
 0x16c   :  { %1861 = vrcp.f32 %v490_v6  ;;  %v458_v7 = vpop.f32.mrf.mxu2  ;;  %v471_v14 = vpop.f32.mrf.mxu3  ;;  %vm513_vm2 = vweird.f32 %v490_v6 }
 0x16f   :  { %v1856_v28 = vpop.eup %1855 }
 0x170   :  { %v1858_v32 = vpop.eup %1857  ;;  %v2307_v42 = vadd.f32 1.0, %v1856_v28  ;;  %v1747_v28 = vld [vmem:[%s2624_s0 + $0x38] sm:$0xff] }
 0x171   :  { %v1860_v40 = vpop.eup %1859  ;;  %v492_v43 = vadd.f32 1.0, %v1858_v32  ;;  %v517_v32 = vand.u32 2147483647, %v490_v6  ;;  %1339 = vperm.xlu1 %1830, %v1747_v28  }
 0x172   :  { %v1862_v62 = vpop.eup %1861  ;;  %v494_v21 = vmul.f32 %v1860_v40, %v2304_v41  ;;  %vm499_vm3 = vweird.f32 %v1860_v40  ;;  %vm528_vm13 = vweird.f32 %v2307_v42 }
 0x173   :  { %v509_v20 = vmul.f32 %v1862_v62, %v490_v6  ;;  %1863 = vrcp.f32 %v492_v43  ;;  %vm514_vm0 = vweird.f32 %v1862_v62  ;;  %v549_v61 = vand.u32 2147483648, %v492_v43  ;;  %vm500_vm9 = vmor %vm498_vm6, %vm499_vm3 }
 0x174   :  { %1865 = vrcp.f32 %v2307_v42  ;;  %v495_v36 = vsub.f32 1.0, %v494_v21  ;;  %v547_v14 = vand.u32 2147483647, %v492_v43  ;;  %vm2318_vm4 = vmor %vm513_vm2, %vm514_vm0  ;;  %vm543_vm5 = vweird.f32 %v492_v43 }
 0x175   :  { %v510_v60 = vsub.f32 1.0, %v509_v20  ;;  %v519_v20 = vand.u32 2147483648, %v490_v6  ;;  %vm518_vm10 = vcmp.eq.f32.partialorder %v517_v32, 8.507059e+37  ;;  %v2665_v32 = vld [vmem:[#allocation8_spill] sm:$0xff] }
 0x176   :  { %v496_v2 = vmul.f32 %v1860_v40, %v495_v36  ;;  %vm548_vm8 = vcmp.eq.f32.partialorder %v547_v14, 8.507059e+37 }
 0x177   :  { %v511_v0 = vmul.f32 %v1862_v62, %v510_v60  ;;  %v520_v52 = vor.u32 1.1754944e-38, %v519_v20 }
 0x178   :  { %v497_v60 = vadd.f32 %v1860_v40, %v496_v2 }
 0x179   :  { %v1864_v23 = vpop.eup %1863  ;;  %v512_v15 = vadd.f32 %v1862_v62, %v511_v0  ;;  %v504_v0 = vand.u32 2147483648, %v2304_v41 }
 0x17a   :  { %v539_v54 = vmul.f32 %v1864_v23, %v492_v43  ;;  %v1866_v5 = vpop.eup %1865  ;;  %vm544_vm1 = vweird.f32 %v1864_v23 }
 0x17b   :  { %v524_v21 = vmul.f32 %v1866_v5, %v2307_v42  ;;  %vm545_vm7 = vmor %vm543_vm5, %vm544_vm1  ;;  %v516_v6 = vsel %vm2318_vm4, %v1862_v62, %v512_v15  ;;  %v505_v33 = vor.u32 1.1754944e-38, %v504_v0  ;;  %vm529_vm12 = vweird.f32 %v1866_v5  ;;  %v2664_v15 = vld [vmem:[#allocation7_spill] sm:$0xff] }
 0x17c   :  { %v540_v55 = vsub.f32 1.0, %v539_v54  ;;  %v550_v54 = vor.u32 1.1754944e-38, %v549_v61  ;;  %v521_v3 = vsel %vm518_vm10, %v520_v52, %v516_v6  ;;  %vm530_vm14 = vmor %vm528_vm13, %vm529_vm12 }
 0x17d   :  { %v525_v56 = vsub.f32 1.0, %v524_v21 }
 0x17e   :  { %v541_v7 = vmul.f32 %v1864_v23, %v540_v55  ;;  %v502_v55 = vand.u32 2147483647, %v2304_v41  ;;  %v555_v41 = vmul.f32 %v521_v3, %v2258_v25 }
 0x17f   :  { %v526_v28 = vmul.f32 %v1866_v5, %v525_v56 }
 0x180   :  { %v542_v16 = vadd.f32 %v1864_v23, %v541_v7  ;;  %v501_v7 = vsel %vm500_vm9, %v1860_v40, %v497_v60  ;;  %vm503_vm11 = vcmp.eq.f32.partialorder %v502_v55, 8.507059e+37 }
 0x181   :  { %v506_v61 = vsel %vm503_vm11, %v505_v33, %v501_v7  ;;  %v527_v62 = vadd.f32 %v1866_v5, %v526_v28 }
 0x182   :  { %v546_v2 = vsel %vm545_vm7, %v1864_v23, %v542_v16  ;;  %v534_v23 = vand.u32 2147483648, %v2307_v42  ;;  %v2666_v16 = vld [vmem:[#allocation9_spill] sm:$0xff] }
 0x183   :  { %v551_v38 = vsel %vm548_vm8, %v550_v54, %v546_v2  ;;  %v531_v52 = vsel %vm530_vm14, %v1866_v5, %v527_v62  ;;  %v2667_v54 = vld [vmem:[#allocation10_spill] sm:$0xff] }
 0x184   :  { %v553_v43 = vmul.f32 2.0, %v551_v38  ;;  %v532_v38 = vand.u32 2147483647, %v2307_v42  ;;  %v535_v40 = vor.u32 1.1754944e-38, %v534_v23  ;;  %v2663_v42 = vld [vmem:[#allocation6_spill] sm:$0xff] }
 0x186   :  { %v1716_v24 = vadd.f32 -1.0, %v553_v43  ;;  %vm533_vm15 = vcmp.eq.f32.partialorder %v532_v38, 8.507059e+37 }
 0x187   :  { %v536_v56 = vsel %vm533_vm15, %v535_v40, %v531_v52 }
 0x188   :  { %v556_v1 = vmul.f32 %v1716_v24, %v506_v61  ;;  %v2668_v61 = vld [vmem:[#allocation11_spill] sm:$0xff] }
 0x18a   :  { %v2328_v36 = vadd.f32 %v556_v1, %v555_v41  ;;  %v565_v1 = vpop.permute.xlu1 %564  ;;  %v2669_v41 = vld [vmem:[#allocation12_spill] sm:$0xff] }
 0x18b   :  { %v567_v3 = vmul.f32 %v565_v1, %v2224_v53  ;;  %v568_v5 = vmul.f32 %v565_v1, %v2663_v42  ;;  %v569_v0 = vmul.f32 %v565_v1, %v2666_v16  ;;  %v570_v55 = vmul.f32 %v565_v1, %v2667_v54 }
 0x18c   :  { %1867 = vtanh.f32 %v2328_v36 }
 0x18d   :  { %v571_v14 = vadd.f32 %v567_v3, %v2664_v15  ;;  %v572_v20 = vadd.f32 %v568_v5, %v2665_v32  ;;  %v573_v28 = vadd.f32 %v569_v0, %v2668_v61  ;;  %v574_v62 = vadd.f32 %v570_v55, %v2669_v41 }
 0x192   :  { %v1868_v33 = vpop.eup %1867 }
 0x193   :  { %v559_v25 = vmul.f32 %v1868_v33, %v536_v56 }
 0x195   :  { %v575_v24 = vpack.c.bf16 %v559_v25, %v559_v25 }
 0x197   :  { %584 = vmatmul.bf16.vlgmr.msra.gmra.mxu0 %v575_v24  ;;  %597 = vmatmul.bf16.vlgmr.msra.gmra.mxu1 %v575_v24 }
 0x198   :  { %610 = vmatmul.bf16.vlgmr.msra.gmra.mxu2 %v575_v24  ;;  %623 = vmatmul.bf16.vlgmr.msra.gmra.mxu3 %v575_v24 }
 0x199   :  { %886 = vmatpush.bf16.msra.mxu0 %v2048_v4  ;;  %899 = vmatpush.bf16.msra.mxu1 %v2050_v8 }
 0x19a   :  { %912 = vmatpush.bf16.msra.mxu2 %v2052_v9  ;;  %925 = vmatpush.bf16.msra.mxu3 %v2055_v13 }
 0x19d   :  { %887 = vmatpush.bf16.msra.mxu0 %v2059_v17  ;;  %900 = vmatpush.bf16.msra.mxu1 %v2061_v18 }
 0x19e   :  { %913 = vmatpush.bf16.msra.mxu2 %v2064_v22  ;;  %926 = vmatpush.bf16.msra.mxu3 %v2066_v26 }
 0x1a1   :  { %888 = vmatpush.bf16.msra.mxu0 %v2069_v30  ;;  %901 = vmatpush.bf16.msra.mxu1 %v2073_v34 }
 0x1a2   :  { %914 = vmatpush.bf16.msra.mxu2 %v2075_v35  ;;  %927 = vmatpush.bf16.msra.mxu3 %v2078_v39 }
 0x1a5   :  { %889 = vmatpush.bf16.msra.mxu0 %v2081_v45  ;;  %902 = vmatpush.bf16.msra.mxu1 %v2085_v46 }
 0x1a6   :  { %915 = vmatpush.bf16.msra.mxu2 %v2087_v47  ;;  %928 = vmatpush.bf16.msra.mxu3 %v2090_v51 }
 0x1a9   :  { %890 = vmatpush.bf16.msra.mxu0 %v2093_v57  ;;  %903 = vmatpush.bf16.msra.mxu1 %v2097_v58 }
 0x1aa   :  { %916 = vmatpush.bf16.msra.mxu2 %v2099_v59  ;;  %929 = vmatpush.bf16.msra.mxu3 %v2102_v63 }
 0x1ad   :  { %891 = vmatpush.bf16.msra.mxu0 %v2108_v10  ;;  %904 = vmatpush.bf16.msra.mxu1 %v2112_v11 }
 0x1ae   :  { %917 = vmatpush.bf16.msra.mxu2 %v2114_v12  ;;  %930 = vmatpush.bf16.msra.mxu3 %v2117_v19 }
 0x1b1   :  { %892 = vmatpush.bf16.msra.mxu0 %v2120_v27  ;;  %905 = vmatpush.bf16.msra.mxu1 %v2124_v29 }
 0x1b2   :  { %918 = vmatpush.bf16.msra.mxu2 %v2126_v31  ;;  %931 = vmatpush.bf16.msra.mxu3 %v2132_v37 }
 0x1b5   :  { %893 = vmatpush.bf16.msra.mxu0 %v2135_v44  ;;  %906 = vmatpush.bf16.msra.mxu1 %v2139_v48 }
 0x1b6   :  { %919 = vmatpush.bf16.msra.mxu2 %v2141_v49  ;;  %932 = vmatpush.bf16.msra.mxu3 %v2144_v50 }
 0x214   :  { %v585_v21 = vpop.f32.mrf.mxu0  ;;  %v598_v60 = vpop.f32.mrf.mxu1 }
 0x215   :  { %v628_v6 = vadd.f32 %v585_v21, %v571_v14  ;;  %v629_v2 = vadd.f32 %v598_v60, %v572_v20 }
 0x217   :  { %v1718_v7 = vmul.f32 -1.442695, %v628_v6  ;;  %v1719_v43 = vmul.f32 -1.442695, %v629_v2 }
 0x219   :  { %1869 = vpow2.f32 %v1718_v7 }
 0x21a   :  { %1871 = vpow2.f32 %v1719_v43 }
 0x21b   :  { %v611_v23 = vpop.f32.mrf.mxu2  ;;  %v624_v38 = vpop.f32.mrf.mxu3 }
 0x21c   :  { %v630_v52 = vadd.f32 %v611_v23, %v573_v28  ;;  %v631_v40 = vadd.f32 %v624_v38, %v574_v62  ;;  %v587_v33 = vpop.f32.mrf.mxu0  ;;  %v600_v56 = vpop.f32.mrf.mxu1 }
 0x21e   :  { %v1720_v25 = vmul.f32 -1.442695, %v630_v52  ;;  %v1721_v24 = vmul.f32 -1.442695, %v631_v40 }
 0x21f   :  { %v1870_v3 = vpop.eup %1869 }
 0x220   :  { %v1872_v1 = vpop.eup %1871  ;;  %v644_v5 = vadd.f32 1.0, %v1870_v3  ;;  %1873 = vpow2.f32 %v1720_v25 }
 0x221   :  { %v645_v14 = vadd.f32 1.0, %v1872_v1  ;;  %1875 = vpow2.f32 %v1721_v24 }
 0x222   :  { %1877 = vrcp.f32 %v644_v5  ;;  %vm653_vm6 = vweird.f32 %v644_v5 }
 0x223   :  { %1879 = vrcp.f32 %v645_v14  ;;  %v613_v20 = vpop.f32.mrf.mxu2  ;;  %v626_v21 = vpop.f32.mrf.mxu3  ;;  %vm668_vm2 = vweird.f32 %v645_v14 }
 0x224   :  { %v672_v21 = vand.u32 2147483647, %v645_v14 }
 0x226   :  { %v1874_v60 = vpop.eup %1873  ;;  %vm673_vm10 = vcmp.eq.f32.partialorder %v672_v21, 8.507059e+37  ;;  %v2674_v21 = vld [vmem:[#allocation8_spill] sm:$0xff] }
 0x227   :  { %v1876_v0 = vpop.eup %1875  ;;  %v646_v7 = vadd.f32 1.0, %v1874_v60  ;;  %v674_v60 = vand.u32 2147483648, %v645_v14 }
 0x228   :  { %v1878_v55 = vpop.eup %1877  ;;  %v647_v6 = vadd.f32 1.0, %v1876_v0 }
 0x229   :  { %v1880_v2 = vpop.eup %1879  ;;  %v649_v28 = vmul.f32 %v1878_v55, %v644_v5  ;;  %vm654_vm3 = vweird.f32 %v1878_v55  ;;  %vm683_vm13 = vweird.f32 %v646_v7 }
 0x22a   :  { %v664_v43 = vmul.f32 %v1880_v2, %v645_v14  ;;  %1881 = vrcp.f32 %v647_v6  ;;  %vm669_vm0 = vweird.f32 %v1880_v2  ;;  %v704_v24 = vand.u32 2147483648, %v647_v6  ;;  %vm655_vm9 = vmor %vm653_vm6, %vm654_vm3 }
 0x22b   :  { %1883 = vrcp.f32 %v646_v7  ;;  %v650_v23 = vsub.f32 1.0, %v649_v28  ;;  %v702_v20 = vand.u32 2147483647, %v647_v6  ;;  %vm2374_vm4 = vmor %vm668_vm2, %vm669_vm0  ;;  %vm698_vm5 = vweird.f32 %v647_v6 }
 0x22c   :  { %v665_v62 = vsub.f32 1.0, %v664_v43  ;;  %v675_v14 = vor.u32 1.1754944e-38, %v674_v60 }
 0x22d   :  { %v651_v56 = vmul.f32 %v1878_v55, %v650_v23  ;;  %v705_v23 = vor.u32 1.1754944e-38, %v704_v24  ;;  %vm703_vm8 = vcmp.eq.f32.partialorder %v702_v20, 8.507059e+37 }
 0x22e   :  { %v666_v52 = vmul.f32 %v1880_v2, %v665_v62  ;;  %v659_v62 = vand.u32 2147483648, %v644_v5 }
 0x22f   :  { %v652_v41 = vadd.f32 %v1878_v55, %v651_v56 }
 0x230   :  { %v1882_v38 = vpop.eup %1881  ;;  %v667_v3 = vadd.f32 %v1880_v2, %v666_v52  ;;  %v657_v52 = vand.u32 2147483647, %v644_v5  ;;  %v660_v32 = vor.u32 1.1754944e-38, %v659_v62 }
 0x231   :  { %v694_v40 = vmul.f32 %v1882_v38, %v647_v6  ;;  %v1884_v33 = vpop.eup %1883  ;;  %vm699_vm1 = vweird.f32 %v1882_v38  ;;  %v656_v54 = vsel %vm655_vm9, %v1878_v55, %v652_v41  ;;  %v687_v41 = vand.u32 2147483647, %v646_v7 }
 0x232   :  { %v679_v0 = vmul.f32 %v1884_v33, %v646_v7  ;;  %vm700_vm7 = vmor %vm698_vm5, %vm699_vm1  ;;  %vm658_vm11 = vcmp.eq.f32.partialorder %v657_v52, 8.507059e+37  ;;  %vm684_vm12 = vweird.f32 %v1884_v33  ;;  %v2675_v52 = vld [vmem:[#allocation9_spill] sm:$0xff] }
 0x233   :  { %v695_v25 = vsub.f32 1.0, %v694_v40  ;;  %v671_v40 = vsel %vm2374_vm4, %v1880_v2, %v667_v3  ;;  %v661_v15 = vsel %vm658_vm11, %v660_v32, %v656_v54  ;;  %vm685_vm14 = vmor %vm683_vm13, %vm684_vm12  ;;  %vm688_vm15 = vcmp.eq.f32.partialorder %v687_v41, 8.507059e+37 }
 0x234   :  { %v680_v56 = vsub.f32 1.0, %v679_v0 }
 0x235   :  { %v696_v1 = vmul.f32 %v1882_v38, %v695_v25 }
 0x236   :  { %v681_v42 = vmul.f32 %v1884_v33, %v680_v56 }
 0x237   :  { %v697_v28 = vadd.f32 %v1882_v38, %v696_v1  ;;  %v676_v1 = vsel %vm673_vm10, %v675_v14, %v671_v40 }
 0x238   :  { %v710_v5 = vmul.f32 %v676_v1, %v2328_v36  ;;  %v682_v2 = vadd.f32 %v1884_v33, %v681_v42  ;;  %v720_v36 = vpop.permute.xlu1 %719 }
 0x239   :  { %v701_v25 = vsel %vm700_vm7, %v1882_v38, %v697_v28  ;;  %v689_v38 = vand.u32 2147483648, %v646_v7  ;;  %v722_v42 = vmul.f32 %v720_v36, %v2224_v53  ;;  %v724_v40 = vmul.f32 %v720_v36, %v2675_v52 }
 0x23a   :  { %v706_v61 = vsel %vm703_vm8, %v705_v23, %v701_v25  ;;  %v2676_v25 = vld [vmem:[#allocation10_spill] sm:$0xff] }
 0x23b   :  { %v708_v16 = vmul.f32 2.0, %v706_v61  ;;  %v686_v61 = vsel %vm685_vm14, %v1884_v33, %v682_v2  ;;  %v690_v55 = vor.u32 1.1754944e-38, %v689_v38  ;;  %v2673_v33 = vld [vmem:[#allocation7_spill] sm:$0xff]  ;;  %v725_v14 = vmul.f32 %v720_v36, %v2676_v25 }
 0x23c   :  { %v726_v20 = vadd.f32 %v722_v42, %v2673_v33 }
 0x23d   :  { %v1722_v6 = vadd.f32 -1.0, %v708_v16  ;;  %v691_v16 = vsel %vm688_vm15, %v690_v55, %v686_v61 }
 0x23f   :  { %v711_v24 = vmul.f32 %v1722_v6, %v661_v15  ;;  %v2672_v15 = vld [vmem:[#allocation6_spill] sm:$0xff]  ;;  %v2677_v6 = vld [vmem:[#allocation11_spill] sm:$0xff] }
 0x240   :  { %v723_v7 = vmul.f32 %v720_v36, %v2672_v15 }
 0x241   :  { %v2381_v43 = vadd.f32 %v711_v24, %v710_v5  ;;  %v728_v5 = vadd.f32 %v724_v40, %v2677_v6  ;;  %v2678_v24 = vld [vmem:[#allocation12_spill] sm:$0xff] }
 0x242   :  { %v727_v60 = vadd.f32 %v723_v7, %v2674_v21  ;;  %v729_v2 = vadd.f32 %v725_v14, %v2678_v24 }
 0x243   :  { %1885 = vtanh.f32 %v2381_v43 }
 0x249   :  { %v1886_v3 = vpop.eup %1885 }
 0x24a   :  { %v714_v32 = vmul.f32 %v1886_v3, %v691_v16 }
 0x24c   :  { %v730_v54 = vpack.c.bf16 %v714_v32, %v714_v32 }
 0x24e   :  { %739 = vmatmul.bf16.vlgmr.msrb.gmra.mxu0 %v730_v54  ;;  %752 = vmatmul.bf16.vlgmr.msrb.gmra.mxu1 %v730_v54 }
 0x24f   :  { %765 = vmatmul.bf16.vlgmr.msrb.gmra.mxu2 %v730_v54  ;;  %778 = vmatmul.bf16.vlgmr.msrb.gmra.mxu3 %v730_v54 }
 0x250   :  { %1041 = vmatpush.bf16.msrb.mxu0 %v2048_v4  ;;  %1054 = vmatpush.bf16.msrb.mxu1 %v2050_v8 }
 0x251   :  { %1067 = vmatpush.bf16.msrb.mxu2 %v2052_v9  ;;  %1080 = vmatpush.bf16.msrb.mxu3 %v2055_v13 }
 0x254   :  { %1042 = vmatpush.bf16.msrb.mxu0 %v2059_v17  ;;  %1055 = vmatpush.bf16.msrb.mxu1 %v2061_v18 }
 0x255   :  { %1068 = vmatpush.bf16.msrb.mxu2 %v2064_v22  ;;  %1081 = vmatpush.bf16.msrb.mxu3 %v2066_v26 }
 0x258   :  { %1043 = vmatpush.bf16.msrb.mxu0 %v2069_v30  ;;  %1056 = vmatpush.bf16.msrb.mxu1 %v2073_v34 }
 0x259   :  { %1069 = vmatpush.bf16.msrb.mxu2 %v2075_v35  ;;  %1082 = vmatpush.bf16.msrb.mxu3 %v2078_v39 }
 0x25c   :  { %1044 = vmatpush.bf16.msrb.mxu0 %v2081_v45  ;;  %1057 = vmatpush.bf16.msrb.mxu1 %v2085_v46 }
 0x25d   :  { %1070 = vmatpush.bf16.msrb.mxu2 %v2087_v47  ;;  %1083 = vmatpush.bf16.msrb.mxu3 %v2090_v51 }
 0x260   :  { %1045 = vmatpush.bf16.msrb.mxu0 %v2093_v57  ;;  %1058 = vmatpush.bf16.msrb.mxu1 %v2097_v58 }
 0x261   :  { %1071 = vmatpush.bf16.msrb.mxu2 %v2099_v59  ;;  %1084 = vmatpush.bf16.msrb.mxu3 %v2102_v63 }
 0x264   :  { %1046 = vmatpush.bf16.msrb.mxu0 %v2108_v10  ;;  %1059 = vmatpush.bf16.msrb.mxu1 %v2112_v11 }
 0x265   :  { %1072 = vmatpush.bf16.msrb.mxu2 %v2114_v12  ;;  %1085 = vmatpush.bf16.msrb.mxu3 %v2117_v19 }
 0x268   :  { %1047 = vmatpush.bf16.msrb.mxu0 %v2120_v27  ;;  %1060 = vmatpush.bf16.msrb.mxu1 %v2124_v29 }
 0x269   :  { %1073 = vmatpush.bf16.msrb.mxu2 %v2126_v31  ;;  %1086 = vmatpush.bf16.msrb.mxu3 %v2132_v37 }
 0x26c   :  { %1048 = vmatpush.bf16.msrb.mxu0 %v2135_v44  ;;  %1061 = vmatpush.bf16.msrb.mxu1 %v2139_v48 }
 0x26d   :  { %1074 = vmatpush.bf16.msrb.mxu2 %v2141_v49  ;;  %1087 = vmatpush.bf16.msrb.mxu3 %v2144_v50 }
 0x2cb   :  { %v740_v0 = vpop.f32.mrf.mxu0  ;;  %v753_v28 = vpop.f32.mrf.mxu1 }
 0x2cc   :  { %v783_v62 = vadd.f32 %v740_v0, %v726_v20  ;;  %v784_v23 = vadd.f32 %v753_v28, %v727_v60 }
 0x2ce   :  { %v1724_v56 = vmul.f32 -1.442695, %v783_v62  ;;  %v1725_v1 = vmul.f32 -1.442695, %v784_v23 }
 0x2d0   :  { %1887 = vpow2.f32 %v1724_v56 }
 0x2d1   :  { %1889 = vpow2.f32 %v1725_v1 }
 0x2d2   :  { %v766_v38 = vpop.f32.mrf.mxu2  ;;  %v779_v41 = vpop.f32.mrf.mxu3 }
 0x2d3   :  { %v785_v61 = vadd.f32 %v766_v38, %v728_v5  ;;  %v786_v55 = vadd.f32 %v779_v41, %v729_v2  ;;  %v742_v3 = vpop.f32.mrf.mxu0  ;;  %v755_v16 = vpop.f32.mrf.mxu1  ;;  %v1729_v41 = vld [vmem:[%s2624_s0 + $0x20] sm:$0xff] }
 0x2d4   :  { %874 = vperm.xlu2 %1831, %v1729_v41  }
 0x2d5   :  { %v1726_v32 = vmul.f32 -1.442695, %v785_v61  ;;  %v1727_v54 = vmul.f32 -1.442695, %v786_v55 }
 0x2d6   :  { %v1888_v42 = vpop.eup %1887 }
 0x2d7   :  { %v1890_v7 = vpop.eup %1889  ;;  %v2424_v20 = vadd.f32 1.0, %v1888_v42  ;;  %1891 = vpow2.f32 %v1726_v32 }
 0x2d8   :  { %v800_v36 = vadd.f32 1.0, %v1890_v7  ;;  %1893 = vpow2.f32 %v1727_v54 }
 0x2d9   :  { %1895 = vrcp.f32 %v2424_v20  ;;  %vm808_vm6 = vweird.f32 %v2424_v20 }
 0x2da   :  { %1897 = vrcp.f32 %v800_v36  ;;  %v768_v60 = vpop.f32.mrf.mxu2  ;;  %v781_v0 = vpop.f32.mrf.mxu3  ;;  %vm823_vm2 = vweird.f32 %v800_v36 }
 0x2dd   :  { %v1892_v28 = vpop.eup %1891 }
 0x2de   :  { %v1894_v62 = vpop.eup %1893  ;;  %v2427_v56 = vadd.f32 1.0, %v1892_v28  ;;  %v1735_v28 = vld [vmem:[%s2624_s0 + $0x28] sm:$0xff] }
 0x2df   :  { %v1896_v23 = vpop.eup %1895  ;;  %v802_v40 = vadd.f32 1.0, %v1894_v62  ;;  %v827_v62 = vand.u32 2147483647, %v800_v36  ;;  %1029 = vperm.xlu2 %1831, %v1735_v28  }
 0x2e0   :  { %v1898_v14 = vpop.eup %1897  ;;  %v804_v5 = vmul.f32 %v1896_v23, %v2424_v20  ;;  %vm809_vm3 = vweird.f32 %v1896_v23  ;;  %vm838_vm13 = vweird.f32 %v2427_v56 }
 0x2e1   :  { %v819_v1 = vmul.f32 %v1898_v14, %v800_v36  ;;  %1899 = vrcp.f32 %v802_v40  ;;  %vm824_vm0 = vweird.f32 %v1898_v14  ;;  %v859_v42 = vand.u32 2147483648, %v802_v40  ;;  %vm810_vm9 = vmor %vm808_vm6, %vm809_vm3 }
 0x2e2   :  { %1901 = vrcp.f32 %v2427_v56  ;;  %v805_v38 = vsub.f32 1.0, %v804_v5  ;;  %v857_v0 = vand.u32 2147483647, %v802_v40  ;;  %vm2438_vm4 = vmor %vm823_vm2, %vm824_vm0  ;;  %vm853_vm5 = vweird.f32 %v802_v40 }
 0x2e3   :  { %v820_v2 = vsub.f32 1.0, %v819_v1  ;;  %v829_v1 = vand.u32 2147483648, %v800_v36  ;;  %vm828_vm10 = vcmp.eq.f32.partialorder %v827_v62, 8.507059e+37  ;;  %v2683_v62 = vld [vmem:[#allocation8_spill] sm:$0xff] }
 0x2e4   :  { %v806_v32 = vmul.f32 %v1896_v23, %v805_v38  ;;  %vm858_vm8 = vcmp.eq.f32.partialorder %v857_v0, 8.507059e+37 }
 0x2e5   :  { %v821_v55 = vmul.f32 %v1898_v14, %v820_v2  ;;  %v830_v24 = vor.u32 1.1754944e-38, %v829_v1 }
 0x2e6   :  { %v807_v2 = vadd.f32 %v1896_v23, %v806_v32 }
 0x2e7   :  { %v1900_v61 = vpop.eup %1899  ;;  %v822_v7 = vadd.f32 %v1898_v14, %v821_v55  ;;  %v814_v55 = vand.u32 2147483648, %v2424_v20 }
 0x2e8   :  { %v849_v3 = vmul.f32 %v1900_v61, %v802_v40  ;;  %v1902_v16 = vpop.eup %1901  ;;  %vm854_vm1 = vweird.f32 %v1900_v61 }
 0x2e9   :  { %v834_v5 = vmul.f32 %v1902_v16, %v2427_v56  ;;  %vm855_vm7 = vmor %vm853_vm5, %vm854_vm1  ;;  %v826_v36 = vsel %vm2438_vm4, %v1898_v14, %v822_v7  ;;  %v815_v52 = vor.u32 1.1754944e-38, %v814_v55  ;;  %vm839_vm12 = vweird.f32 %v1902_v16  ;;  %v2682_v7 = vld [vmem:[#allocation7_spill] sm:$0xff] }
 0x2ea   :  { %v850_v54 = vsub.f32 1.0, %v849_v3  ;;  %v860_v3 = vor.u32 1.1754944e-38, %v859_v42  ;;  %v831_v21 = vsel %vm828_vm10, %v830_v24, %v826_v36  ;;  %vm840_vm14 = vmor %vm838_vm13, %vm839_vm12 }
 0x2eb   :  { %v835_v6 = vsub.f32 1.0, %v834_v5 }
 0x2ec   :  { %v851_v60 = vmul.f32 %v1900_v61, %v850_v54  ;;  %v812_v54 = vand.u32 2147483647, %v2424_v20  ;;  %v865_v20 = vmul.f32 %v831_v21, %v2381_v43 }
 0x2ed   :  { %v836_v28 = vmul.f32 %v1902_v16, %v835_v6 }
 0x2ee   :  { %v852_v41 = vadd.f32 %v1900_v61, %v851_v60  ;;  %v811_v60 = vsel %vm810_vm9, %v1896_v23, %v807_v2  ;;  %vm813_vm11 = vcmp.eq.f32.partialorder %v812_v54, 8.507059e+37 }
 0x2ef   :  { %v816_v42 = vsel %vm813_vm11, %v815_v52, %v811_v60  ;;  %v837_v14 = vadd.f32 %v1902_v16, %v836_v28 }
 0x2f0   :  { %v856_v32 = vsel %vm855_vm7, %v1900_v61, %v852_v41  ;;  %v844_v61 = vand.u32 2147483648, %v2427_v56  ;;  %v2684_v41 = vld [vmem:[#allocation9_spill] sm:$0xff] }
 0x2f1   :  { %v861_v25 = vsel %vm858_vm8, %v860_v3, %v856_v32  ;;  %v841_v24 = vsel %vm840_vm14, %v1902_v16, %v837_v14  ;;  %v2685_v3 = vld [vmem:[#allocation10_spill] sm:$0xff] }
 0x2f2   :  { %v863_v40 = vmul.f32 2.0, %v861_v25  ;;  %v842_v25 = vand.u32 2147483647, %v2427_v56  ;;  %v845_v23 = vor.u32 1.1754944e-38, %v844_v61  ;;  %v2681_v56 = vld [vmem:[#allocation6_spill] sm:$0xff] }
 0x2f4   :  { %v1728_v33 = vadd.f32 -1.0, %v863_v40  ;;  %vm843_vm15 = vcmp.eq.f32.partialorder %v842_v25, 8.507059e+37 }
 0x2f5   :  { %v846_v6 = vsel %vm843_vm15, %v845_v23, %v841_v24 }
 0x2f6   :  { %v866_v15 = vmul.f32 %v1728_v33, %v816_v42  ;;  %v2686_v42 = vld [vmem:[#allocation11_spill] sm:$0xff] }
 0x2f8   :  { %v2448_v38 = vadd.f32 %v866_v15, %v865_v20  ;;  %v2687_v20 = vld [vmem:[#allocation12_spill] sm:$0xff] }
 0x2fa   :  { %1903 = vtanh.f32 %v2448_v38 }
 0x300   :  { %v1904_v52 = vpop.eup %1903 }
 0x301   :  { %v869_v43 = vmul.f32 %v1904_v52, %v846_v6 }
 0x303   :  { %v885_v33 = vpack.c.bf16 %v869_v43, %v869_v43 }
 0x305   :  { %894 = vmatmul.bf16.vlgmr.msra.gmra.mxu0 %v885_v33  ;;  %907 = vmatmul.bf16.vlgmr.msra.gmra.mxu1 %v885_v33 }
 0x306   :  { %920 = vmatmul.bf16.vlgmr.msra.gmra.mxu2 %v885_v33  ;;  %933 = vmatmul.bf16.vlgmr.msra.gmra.mxu3 %v885_v33 }
 0x307   :  { %1196 = vmatpush.bf16.msra.mxu0 %v2048_v4  ;;  %1209 = vmatpush.bf16.msra.mxu1 %v2050_v8 }
 0x308   :  { %1222 = vmatpush.bf16.msra.mxu2 %v2052_v9  ;;  %1235 = vmatpush.bf16.msra.mxu3 %v2055_v13 }
 0x30b   :  { %1197 = vmatpush.bf16.msra.mxu0 %v2059_v17  ;;  %1210 = vmatpush.bf16.msra.mxu1 %v2061_v18 }
 0x30c   :  { %1223 = vmatpush.bf16.msra.mxu2 %v2064_v22  ;;  %1236 = vmatpush.bf16.msra.mxu3 %v2066_v26 }
 0x30f   :  { %1198 = vmatpush.bf16.msra.mxu0 %v2069_v30  ;;  %1211 = vmatpush.bf16.msra.mxu1 %v2073_v34 }
 0x310   :  { %1224 = vmatpush.bf16.msra.mxu2 %v2075_v35  ;;  %1237 = vmatpush.bf16.msra.mxu3 %v2078_v39 }
 0x313   :  { %1199 = vmatpush.bf16.msra.mxu0 %v2081_v45  ;;  %1212 = vmatpush.bf16.msra.mxu1 %v2085_v46 }
 0x314   :  { %1225 = vmatpush.bf16.msra.mxu2 %v2087_v47  ;;  %1238 = vmatpush.bf16.msra.mxu3 %v2090_v51 }
 0x317   :  { %1200 = vmatpush.bf16.msra.mxu0 %v2093_v57  ;;  %1213 = vmatpush.bf16.msra.mxu1 %v2097_v58 }
 0x318   :  { %1226 = vmatpush.bf16.msra.mxu2 %v2099_v59  ;;  %1239 = vmatpush.bf16.msra.mxu3 %v2102_v63 }
 0x31b   :  { %1201 = vmatpush.bf16.msra.mxu0 %v2108_v10  ;;  %1214 = vmatpush.bf16.msra.mxu1 %v2112_v11 }
 0x31c   :  { %1227 = vmatpush.bf16.msra.mxu2 %v2114_v12  ;;  %1240 = vmatpush.bf16.msra.mxu3 %v2117_v19 }
 0x31f   :  { %1202 = vmatpush.bf16.msra.mxu0 %v2120_v27  ;;  %1215 = vmatpush.bf16.msra.mxu1 %v2124_v29 }
 0x320   :  { %1228 = vmatpush.bf16.msra.mxu2 %v2126_v31  ;;  %1241 = vmatpush.bf16.msra.mxu3 %v2132_v37 }
 0x323   :  { %1203 = vmatpush.bf16.msra.mxu0 %v2135_v44  ;;  %1216 = vmatpush.bf16.msra.mxu1 %v2139_v48 }
 0x324   :  { %1229 = vmatpush.bf16.msra.mxu2 %v2141_v49  ;;  %1242 = vmatpush.bf16.msra.mxu3 %v2144_v50 }
 0x32e   :  { %v875_v15 = vpop.permute.xlu2 %874 }
 0x32f   :  { %v877_v21 = vmul.f32 %v875_v15, %v2224_v53  ;;  %v878_v16 = vmul.f32 %v875_v15, %v2681_v56  ;;  %v879_v55 = vmul.f32 %v875_v15, %v2684_v41  ;;  %v880_v54 = vmul.f32 %v875_v15, %v2685_v3 }
 0x331   :  { %v881_v0 = vadd.f32 %v877_v21, %v2682_v7  ;;  %v882_v1 = vadd.f32 %v878_v16, %v2683_v62  ;;  %v883_v28 = vadd.f32 %v879_v55, %v2686_v42  ;;  %v884_v14 = vadd.f32 %v880_v54, %v2687_v20 }
 0x382   :  { %v895_v5 = vpop.f32.mrf.mxu0  ;;  %v908_v2 = vpop.f32.mrf.mxu1 }
 0x383   :  { %v938_v36 = vadd.f32 %v895_v5, %v881_v0  ;;  %v939_v32 = vadd.f32 %v908_v2, %v882_v1 }
 0x385   :  { %v1730_v60 = vmul.f32 -1.442695, %v938_v36  ;;  %v1731_v40 = vmul.f32 -1.442695, %v939_v32 }
 0x387   :  { %1905 = vpow2.f32 %v1730_v60 }
 0x388   :  { %1907 = vpow2.f32 %v1731_v40 }
 0x389   :  { %v921_v61 = vpop.f32.mrf.mxu2  ;;  %v934_v25 = vpop.f32.mrf.mxu3 }
 0x38a   :  { %v940_v24 = vadd.f32 %v921_v61, %v883_v28  ;;  %v941_v23 = vadd.f32 %v934_v25, %v884_v14  ;;  %v897_v52 = vpop.f32.mrf.mxu0  ;;  %v910_v6 = vpop.f32.mrf.mxu1 }
 0x38c   :  { %v1732_v43 = vmul.f32 -1.442695, %v940_v24  ;;  %v1733_v33 = vmul.f32 -1.442695, %v941_v23 }
 0x38d   :  { %v1906_v21 = vpop.eup %1905 }
 0x38e   :  { %v1908_v15 = vpop.eup %1907  ;;  %v954_v16 = vadd.f32 1.0, %v1906_v21  ;;  %1909 = vpow2.f32 %v1732_v43 }
 0x38f   :  { %v955_v0 = vadd.f32 1.0, %v1908_v15  ;;  %1911 = vpow2.f32 %v1733_v33 }
 0x390   :  { %1913 = vrcp.f32 %v954_v16  ;;  %vm963_vm6 = vweird.f32 %v954_v16 }
 0x391   :  { %1915 = vrcp.f32 %v955_v0  ;;  %v923_v1 = vpop.f32.mrf.mxu2  ;;  %v936_v5 = vpop.f32.mrf.mxu3  ;;  %vm978_vm2 = vweird.f32 %v955_v0 }
 0x392   :  { %v982_v5 = vand.u32 2147483647, %v955_v0 }
 0x394   :  { %v1910_v2 = vpop.eup %1909  ;;  %vm983_vm10 = vcmp.eq.f32.partialorder %v982_v5, 8.507059e+37 }
 0x395   :  { %v1912_v55 = vpop.eup %1911  ;;  %v956_v60 = vadd.f32 1.0, %v1910_v2  ;;  %v984_v2 = vand.u32 2147483648, %v955_v0 }
 0x396   :  { %v1914_v54 = vpop.eup %1913  ;;  %v957_v36 = vadd.f32 1.0, %v1912_v55 }
 0x397   :  { %v1916_v32 = vpop.eup %1915  ;;  %v959_v28 = vmul.f32 %v1914_v54, %v954_v16  ;;  %vm964_vm3 = vweird.f32 %v1914_v54  ;;  %vm993_vm13 = vweird.f32 %v956_v60 }
 0x398   :  { %v974_v40 = vmul.f32 %v1916_v32, %v955_v0  ;;  %1917 = vrcp.f32 %v957_v36  ;;  %vm979_vm0 = vweird.f32 %v1916_v32  ;;  %v1014_v33 = vand.u32 2147483648, %v957_v36  ;;  %vm965_vm9 = vmor %vm963_vm6, %vm964_vm3 }
 0x399   :  { %1919 = vrcp.f32 %v956_v60  ;;  %v960_v61 = vsub.f32 1.0, %v959_v28  ;;  %v1012_v1 = vand.u32 2147483647, %v957_v36  ;;  %vm2494_vm4 = vmor %vm978_vm2, %vm979_vm0  ;;  %vm1008_vm5 = vweird.f32 %v957_v36 }
 0x39a   :  { %v975_v14 = vsub.f32 1.0, %v974_v40  ;;  %v985_v0 = vor.u32 1.1754944e-38, %v984_v2 }
 0x39b   :  { %v961_v6 = vmul.f32 %v1914_v54, %v960_v61  ;;  %v1015_v61 = vor.u32 1.1754944e-38, %v1014_v33  ;;  %vm1013_vm8 = vcmp.eq.f32.partialorder %v1012_v1, 8.507059e+37 }
 0x39c   :  { %v976_v24 = vmul.f32 %v1916_v32, %v975_v14  ;;  %v969_v14 = vand.u32 2147483648, %v954_v16 }
 0x39d   :  { %v962_v20 = vadd.f32 %v1914_v54, %v961_v6 }
 0x39e   :  { %v1918_v25 = vpop.eup %1917  ;;  %v977_v21 = vadd.f32 %v1916_v32, %v976_v24  ;;  %v967_v24 = vand.u32 2147483647, %v954_v16  ;;  %v970_v62 = vor.u32 1.1754944e-38, %v969_v14 }
 0x39f   :  { %v1004_v23 = vmul.f32 %v1918_v25, %v957_v36  ;;  %v1920_v52 = vpop.eup %1919  ;;  %vm1009_vm1 = vweird.f32 %v1918_v25  ;;  %v966_v3 = vsel %vm965_vm9, %v1914_v54, %v962_v20  ;;  %v997_v20 = vand.u32 2147483647, %v956_v60 }
 0x3a0   :  { %v989_v55 = vmul.f32 %v1920_v52, %v956_v60  ;;  %vm1010_vm7 = vmor %vm1008_vm5, %vm1009_vm1  ;;  %vm968_vm11 = vcmp.eq.f32.partialorder %v967_v24, 8.507059e+37  ;;  %vm994_vm12 = vweird.f32 %v1920_v52 }
 0x3a1   :  { %v1005_v43 = vsub.f32 1.0, %v1004_v23  ;;  %v981_v23 = vsel %vm2494_vm4, %v1916_v32, %v977_v21  ;;  %v971_v7 = vsel %vm968_vm11, %v970_v62, %v966_v3  ;;  %vm995_vm14 = vmor %vm993_vm13, %vm994_vm12  ;;  %vm998_vm15 = vcmp.eq.f32.partialorder %v997_v20, 8.507059e+37 }
 0x3a2   :  { %v990_v6 = vsub.f32 1.0, %v989_v55 }
 0x3a3   :  { %v1006_v15 = vmul.f32 %v1918_v25, %v1005_v43 }
 0x3a4   :  { %v991_v56 = vmul.f32 %v1920_v52, %v990_v6 }
 0x3a5   :  { %v1007_v28 = vadd.f32 %v1918_v25, %v1006_v15  ;;  %v986_v15 = vsel %vm983_vm10, %v985_v0, %v981_v23 }
 0x3a6   :  { %v1020_v16 = vmul.f32 %v986_v15, %v2448_v38  ;;  %v992_v32 = vadd.f32 %v1920_v52, %v991_v56 }
 0x3a7   :  { %v1011_v43 = vsel %vm1010_vm7, %v1918_v25, %v1007_v28  ;;  %v999_v25 = vand.u32 2147483648, %v956_v60 }
 0x3a8   :  { %v1016_v42 = vsel %vm1013_vm8, %v1015_v61, %v1011_v43 }
 0x3a9   :  { %v1018_v41 = vmul.f32 2.0, %v1016_v42  ;;  %v996_v42 = vsel %vm995_vm14, %v1920_v52, %v992_v32  ;;  %v1000_v54 = vor.u32 1.1754944e-38, %v999_v25 }
 0x3ab   :  { %v1734_v36 = vadd.f32 -1.0, %v1018_v41  ;;  %v1001_v41 = vsel %vm998_vm15, %v1000_v54, %v996_v42 }
 0x3ad   :  { %v1021_v33 = vmul.f32 %v1734_v36, %v971_v7 }
 0x3af   :  { %v2501_v40 = vadd.f32 %v1021_v33, %v1020_v16 }
 0x3b1   :  { %1921 = vtanh.f32 %v2501_v40 }
 0x3b7   :  { %v1922_v21 = vpop.eup %1921 }
 0x3b8   :  { %v1024_v62 = vmul.f32 %v1922_v21, %v1001_v41 }
 0x3ba   :  { %v1040_v3 = vpack.c.bf16 %v1024_v62, %v1024_v62 }
 0x3bc   :  { %1049 = vmatmul.bf16.vlgmr.msrb.gmra.mxu0 %v1040_v3  ;;  %1062 = vmatmul.bf16.vlgmr.msrb.gmra.mxu1 %v1040_v3 }
 0x3bd   :  { %1075 = vmatmul.bf16.vlgmr.msrb.gmra.mxu2 %v1040_v3  ;;  %1088 = vmatmul.bf16.vlgmr.msrb.gmra.mxu3 %v1040_v3 }
 0x3be   :  { %1351 = vmatpush.bf16.msrb.mxu0 %v2048_v4  ;;  %1364 = vmatpush.bf16.msrb.mxu1 %v2050_v8  ;;  %v1030_v4 = vpop.permute.xlu2 %1029 }
 0x3bf   :  { %1377 = vmatpush.bf16.msrb.mxu2 %v2052_v9  ;;  %1390 = vmatpush.bf16.msrb.mxu3 %v2055_v13  ;;  %v1032_v8 = vmul.f32 %v1030_v4, %v2224_v53  ;;  %v2690_v9 = vld [vmem:[#allocation6_spill] sm:$0xff] }
 0x3c0   :  { %v1033_v13 = vmul.f32 %v1030_v4, %v2690_v9 }
 0x3c2   :  { %1352 = vmatpush.bf16.msrb.mxu0 %v2059_v17  ;;  %1365 = vmatpush.bf16.msrb.mxu1 %v2061_v18  ;;  %v2691_v17 = vld [vmem:[#allocation7_spill] sm:$0xff] }
 0x3c3   :  { %1378 = vmatpush.bf16.msrb.mxu2 %v2064_v22  ;;  %1391 = vmatpush.bf16.msrb.mxu3 %v2066_v26  ;;  %v1036_v18 = vadd.f32 %v1032_v8, %v2691_v17  ;;  %v2692_v22 = vld [vmem:[#allocation8_spill] sm:$0xff] }
 0x3c4   :  { %v1037_v26 = vadd.f32 %v1033_v13, %v2692_v22 }
 0x3c6   :  { %1353 = vmatpush.bf16.msrb.mxu0 %v2069_v30  ;;  %1366 = vmatpush.bf16.msrb.mxu1 %v2073_v34 }
 0x3c7   :  { %1379 = vmatpush.bf16.msrb.mxu2 %v2075_v35  ;;  %1392 = vmatpush.bf16.msrb.mxu3 %v2078_v39 }
 0x3ca   :  { %1354 = vmatpush.bf16.msrb.mxu0 %v2081_v45  ;;  %1367 = vmatpush.bf16.msrb.mxu1 %v2085_v46  ;;  %v2693_v45 = vld [vmem:[#allocation9_spill] sm:$0xff] }
 0x3cb   :  { %1380 = vmatpush.bf16.msrb.mxu2 %v2087_v47  ;;  %1393 = vmatpush.bf16.msrb.mxu3 %v2090_v51  ;;  %v1034_v46 = vmul.f32 %v1030_v4, %v2693_v45  ;;  %v2694_v47 = vld [vmem:[#allocation10_spill] sm:$0xff] }
 0x3cc   :  { %v1035_v51 = vmul.f32 %v1030_v4, %v2694_v47 }
 0x3ce   :  { %1355 = vmatpush.bf16.msrb.mxu0 %v2093_v57  ;;  %1368 = vmatpush.bf16.msrb.mxu1 %v2097_v58 }
 0x3cf   :  { %1381 = vmatpush.bf16.msrb.mxu2 %v2099_v59  ;;  %1394 = vmatpush.bf16.msrb.mxu3 %v2102_v63  ;;  %v2695_v59 = vld [vmem:[#allocation11_spill] sm:$0xff] }
 0x3d0   :  { %v1038_v63 = vadd.f32 %v1034_v46, %v2695_v59 }
 0x3d2   :  { %1356 = vmatpush.bf16.msrb.mxu0 %v2108_v10  ;;  %1369 = vmatpush.bf16.msrb.mxu1 %v2112_v11  ;;  %v2696_v10 = vld [vmem:[#allocation12_spill] sm:$0xff] }
 0x3d3   :  { %1382 = vmatpush.bf16.msrb.mxu2 %v2114_v12  ;;  %1395 = vmatpush.bf16.msrb.mxu3 %v2117_v19  ;;  %v1039_v11 = vadd.f32 %v1035_v51, %v2696_v10 }
 0x3d6   :  { %1357 = vmatpush.bf16.msrb.mxu0 %v2120_v27  ;;  %1370 = vmatpush.bf16.msrb.mxu1 %v2124_v29 }
 0x3d7   :  { %1383 = vmatpush.bf16.msrb.mxu2 %v2126_v31  ;;  %1396 = vmatpush.bf16.msrb.mxu3 %v2132_v37 }
 0x3da   :  { %1358 = vmatpush.bf16.msrb.mxu0 %v2135_v44  ;;  %1371 = vmatpush.bf16.msrb.mxu1 %v2139_v48 }
 0x3db   :  { %1384 = vmatpush.bf16.msrb.mxu2 %v2141_v49  ;;  %1397 = vmatpush.bf16.msrb.mxu3 %v2144_v50 }
 0x439   :  { %v1050_v30 = vpop.f32.mrf.mxu0  ;;  %v1063_v34 = vpop.f32.mrf.mxu1 }
 0x43a   :  { %v1093_v35 = vadd.f32 %v1050_v30, %v1036_v18  ;;  %v1094_v39 = vadd.f32 %v1063_v34, %v1037_v26 }
 0x43c   :  { %v1736_v57 = vmul.f32 -1.442695, %v1093_v35  ;;  %v1737_v58 = vmul.f32 -1.442695, %v1094_v39 }
 0x43e   :  { %1923 = vpow2.f32 %v1736_v57 }
 0x43f   :  { %1925 = vpow2.f32 %v1737_v58 }
 0x440   :  { %v1076_v12 = vpop.f32.mrf.mxu2  ;;  %v1089_v19 = vpop.f32.mrf.mxu3 }
 0x441   :  { %v1095_v27 = vadd.f32 %v1076_v12, %v1038_v63  ;;  %v1096_v29 = vadd.f32 %v1089_v19, %v1039_v11  ;;  %v1052_v31 = vpop.f32.mrf.mxu0  ;;  %v1065_v37 = vpop.f32.mrf.mxu1 }
 0x443   :  { %v1738_v44 = vmul.f32 -1.442695, %v1095_v27  ;;  %v1739_v48 = vmul.f32 -1.442695, %v1096_v29 }
 0x444   :  { %v1924_v49 = vpop.eup %1923 }
 0x445   :  { %v1926_v50 = vpop.eup %1925  ;;  %v1109_v38 = vadd.f32 1.0, %v1924_v49  ;;  %1927 = vpow2.f32 %v1738_v44 }
 0x446   :  { %v1110_v56 = vadd.f32 1.0, %v1926_v50  ;;  %1929 = vpow2.f32 %v1739_v48 }
 0x447   :  { %1931 = vrcp.f32 %v1109_v38  ;;  %vm1118_vm6 = vweird.f32 %v1109_v38  ;;  %v1124_v4 = vand.u32 2147483648, %v1109_v38  ;;  %v1122_v13 = vand.u32 2147483647, %v1109_v38 }
 0x448   :  { %1933 = vrcp.f32 %v1110_v56  ;;  %v1078_v7 = vpop.f32.mrf.mxu2  ;;  %v1091_v60 = vpop.f32.mrf.mxu3  ;;  %vm1133_vm2 = vweird.f32 %v1110_v56  ;;  %v1137_v42 = vand.u32 2147483647, %v1110_v56  ;;  %v1139_v54 = vand.u32 2147483648, %v1110_v56 }
 0x449   :  { %v1125_v51 = vor.u32 1.1754944e-38, %v1124_v4  ;;  %vm1123_vm11 = vcmp.eq.f32.partialorder %v1122_v13, 8.507059e+37 }
 0x44a   :  { %v1140_v30 = vor.u32 1.1754944e-38, %v1139_v54  ;;  %vm1138_vm10 = vcmp.eq.f32.partialorder %v1137_v42, 8.507059e+37 }
 0x44b   :  { %v1928_v52 = vpop.eup %1927 }
 0x44c   :  { %v1930_v1 = vpop.eup %1929  ;;  %v1111_v28 = vadd.f32 1.0, %v1928_v52 }
 0x44d   :  { %v1932_v5 = vpop.eup %1931  ;;  %v1112_v2 = vadd.f32 1.0, %v1930_v1 }
 0x44e   :  { %v1934_v55 = vpop.eup %1933  ;;  %v1114_v61 = vmul.f32 %v1932_v5, %v1109_v38  ;;  %vm1119_vm3 = vweird.f32 %v1932_v5  ;;  %v1154_v31 = vand.u32 2147483648, %v1111_v28  ;;  %vm1148_vm13 = vweird.f32 %v1111_v28 }
 0x44f   :  { %v1129_v14 = vmul.f32 %v1934_v55, %v1110_v56  ;;  %1935 = vrcp.f32 %v1112_v2  ;;  %vm1134_vm0 = vweird.f32 %v1934_v55  ;;  %v1169_v33 = vand.u32 2147483648, %v1112_v2  ;;  %vm1120_vm9 = vmor %vm1118_vm6, %vm1119_vm3 }
 0x450   :  { %1937 = vrcp.f32 %v1111_v28  ;;  %v1115_v23 = vsub.f32 1.0, %v1114_v61  ;;  %v1167_v20 = vand.u32 2147483647, %v1112_v2  ;;  %vm2544_vm4 = vmor %vm1133_vm2, %vm1134_vm0  ;;  %vm1163_vm5 = vweird.f32 %v1112_v2 }
 0x451   :  { %v1130_v24 = vsub.f32 1.0, %v1129_v14  ;;  %v1170_v8 = vor.u32 1.1754944e-38, %v1169_v33  ;;  %v1152_v37 = vand.u32 2147483647, %v1111_v28  ;;  %v1155_v48 = vor.u32 1.1754944e-38, %v1154_v31 }
 0x452   :  { %v1116_v36 = vmul.f32 %v1932_v5, %v1115_v23  ;;  %vm1168_vm8 = vcmp.eq.f32.partialorder %v1167_v20, 8.507059e+37 }
 0x453   :  { %v1131_v0 = vmul.f32 %v1934_v55, %v1130_v24  ;;  %vm1153_vm15 = vcmp.eq.f32.partialorder %v1152_v37, 8.507059e+37 }
 0x454   :  { %v1117_v41 = vadd.f32 %v1932_v5, %v1116_v36 }
 0x455   :  { %v1936_v43 = vpop.eup %1935  ;;  %v1132_v32 = vadd.f32 %v1934_v55, %v1131_v0 }
 0x456   :  { %v1159_v6 = vmul.f32 %v1936_v43, %v1112_v2  ;;  %v1938_v15 = vpop.eup %1937  ;;  %vm1164_vm1 = vweird.f32 %v1936_v43  ;;  %v1121_v39 = vsel %vm1120_vm9, %v1932_v5, %v1117_v41 }
 0x457   :  { %v1144_v21 = vmul.f32 %v1938_v15, %v1111_v28  ;;  %vm1165_vm7 = vmor %vm1163_vm5, %vm1164_vm1  ;;  %v1136_v18 = vsel %vm2544_vm4, %v1934_v55, %v1132_v32  ;;  %v1126_v63 = vsel %vm1123_vm11, %v1125_v51, %v1121_v39  ;;  %vm1149_vm12 = vweird.f32 %v1938_v15 }
 0x458   :  { %v1160_v16 = vsub.f32 1.0, %v1159_v6  ;;  %v1141_v57 = vsel %vm1138_vm10, %v1140_v30, %v1136_v18  ;;  %vm1150_vm14 = vmor %vm1148_vm13, %vm1149_vm12 }
 0x459   :  { %v1145_v34 = vsub.f32 1.0, %v1144_v21  ;;  %v1175_v12 = vmul.f32 %v1141_v57, %v2501_v40  ;;  %v1185_v40 = vpop.permute.xlu0 %1184 }
 0x45a   :  { %v1161_v25 = vmul.f32 %v1936_v43, %v1160_v16  ;;  %v1187_v7 = vmul.f32 %v1185_v40, %v2224_v53  ;;  %v1188_v60 = vmul.f32 %v1185_v40, %v2690_v9  ;;  %v1189_v14 = vmul.f32 %v1185_v40, %v2693_v45 }
 0x45b   :  { %v1146_v11 = vmul.f32 %v1938_v15, %v1145_v34  ;;  %v1190_v61 = vmul.f32 %v1185_v40, %v2694_v47 }
 0x45c   :  { %v1162_v3 = vadd.f32 %v1936_v43, %v1161_v25  ;;  %v1191_v52 = vadd.f32 %v1187_v7, %v2691_v17  ;;  %v1192_v1 = vadd.f32 %v1188_v60, %v2692_v22 }
 0x45d   :  { %v1147_v29 = vadd.f32 %v1938_v15, %v1146_v11  ;;  %v1194_v0 = vadd.f32 %v1190_v61, %v2696_v10 }
 0x45e   :  { %v1166_v26 = vsel %vm1165_vm7, %v1936_v43, %v1162_v3  ;;  %v1193_v43 = vadd.f32 %v1189_v14, %v2695_v59 }
 0x45f   :  { %v1171_v35 = vsel %vm1168_vm8, %v1170_v8, %v1166_v26  ;;  %v1151_v44 = vsel %vm1150_vm14, %v1938_v15, %v1147_v29 }
 0x460   :  { %v1173_v46 = vmul.f32 2.0, %v1171_v35  ;;  %v1156_v50 = vsel %vm1153_vm15, %v1155_v48, %v1151_v44 }
 0x462   :  { %v1740_v58 = vadd.f32 -1.0, %v1173_v46 }
 0x464   :  { %v1176_v19 = vmul.f32 %v1740_v58, %v1126_v63 }
 0x466   :  { %v2551_v27 = vadd.f32 %v1176_v19, %v1175_v12 }
 0x468   :  { %1939 = vtanh.f32 %v2551_v27 }
 0x46e   :  { %v1940_v49 = vpop.eup %1939 }
 0x46f   :  { %v1179_v38 = vmul.f32 %v1940_v49, %v1156_v50 }
 0x471   :  { %v1195_v56 = vpack.c.bf16 %v1179_v38, %v1179_v38  ;;  %v1818_v38 = vld [vmem:[%s2628_s4 + $0x8] sm:$0xff] }
 0x473   :  { %1204 = vmatmul.bf16.vlgmr.msra.gmra.mxu0 %v1195_v56  ;;  %1217 = vmatmul.bf16.vlgmr.msra.gmra.mxu1 %v1195_v56 }
 0x474   :  { %1230 = vmatmul.bf16.vlgmr.msra.gmra.mxu2 %v1195_v56  ;;  %1243 = vmatmul.bf16.vlgmr.msra.gmra.mxu3 %v1195_v56 }
 0x4f0   :  { %v1205_v5 = vpop.f32.mrf.mxu0  ;;  %v1218_v2 = vpop.f32.mrf.mxu1 }
 0x4f1   :  { %v1248_v55 = vadd.f32 %v1205_v5, %v1191_v52  ;;  %v1249_v28 = vadd.f32 %v1218_v2, %v1192_v1 }
 0x4f3   :  { %v1742_v24 = vmul.f32 -1.442695, %v1248_v55  ;;  %v1743_v23 = vmul.f32 -1.442695, %v1249_v28 }
 0x4f5   :  { %1941 = vpow2.f32 %v1742_v24 }
 0x4f6   :  { %1943 = vpow2.f32 %v1743_v23 }
 0x4f7   :  { %v1231_v6 = vpop.f32.mrf.mxu2  ;;  %v1244_v15 = vpop.f32.mrf.mxu3 }
 0x4f8   :  { %v1250_v36 = vadd.f32 %v1231_v6, %v1193_v43  ;;  %v1251_v16 = vadd.f32 %v1244_v15, %v1194_v0  ;;  %v1207_v33 = vpop.f32.mrf.mxu0  ;;  %v1220_v32 = vpop.f32.mrf.mxu1 }
 0x4fa   :  { %v1744_v25 = vmul.f32 -1.442695, %v1250_v36  ;;  %v1745_v20 = vmul.f32 -1.442695, %v1251_v16 }
 0x4fb   :  { %v1942_v42 = vpop.eup %1941 }
 0x4fc   :  { %v1944_v54 = vpop.eup %1943  ;;  %v1264_v21 = vadd.f32 1.0, %v1942_v42  ;;  %1945 = vpow2.f32 %v1744_v25 }
 0x4fd   :  { %v1265_v41 = vadd.f32 1.0, %v1944_v54  ;;  %1947 = vpow2.f32 %v1745_v20 }
 0x4fe   :  { %1949 = vrcp.f32 %v1264_v21  ;;  %vm1273_vm6 = vweird.f32 %v1264_v21  ;;  %v1279_v40 = vand.u32 2147483648, %v1264_v21  ;;  %v1277_v60 = vand.u32 2147483647, %v1264_v21 }
 0x4ff   :  { %1951 = vrcp.f32 %v1265_v41  ;;  %v1233_v62 = vpop.f32.mrf.mxu2  ;;  %v1246_v3 = vpop.f32.mrf.mxu3  ;;  %vm1288_vm2 = vweird.f32 %v1265_v41  ;;  %v1292_v44 = vand.u32 2147483647, %v1265_v41  ;;  %v1294_v48 = vand.u32 2147483648, %v1265_v41 }
 0x500   :  { %v1280_v61 = vor.u32 1.1754944e-38, %v1279_v40  ;;  %vm1278_vm11 = vcmp.eq.f32.partialorder %v1277_v60, 8.507059e+37  ;;  %v1824_v62 = vld [vmem:[%s2628_s4 + $0x38] sm:$0xff] }
 0x501   :  { %v1295_v5 = vor.u32 1.1754944e-38, %v1294_v48  ;;  %vm1293_vm10 = vcmp.eq.f32.partialorder %v1292_v44, 8.507059e+37  ;;  %1559 = vmatpush.bf16.msra.mxu0 %v1824_v62  ;;  %v1819_v44 = vld [vmem:[%s2628_s4 + $0x10] sm:$0xff] }
 0x502   :  { %v1946_v4 = vpop.eup %1945 }
 0x503   :  { %v1948_v8 = vpop.eup %1947  ;;  %v1266_v30 = vadd.f32 1.0, %v1946_v4 }
 0x504   :  { %v1950_v13 = vpop.eup %1949  ;;  %v1267_v18 = vadd.f32 1.0, %v1948_v8  ;;  %v1823_v8 = vld [vmem:[%s2628_s4 + $0x30] sm:$0xff] }
 0x505   :  { %v1952_v26 = vpop.eup %1951  ;;  %v1269_v35 = vmul.f32 %v1950_v13, %v1264_v21  ;;  %vm1274_vm3 = vweird.f32 %v1950_v13  ;;  %v1309_v33 = vand.u32 2147483648, %v1266_v30  ;;  %vm1303_vm13 = vweird.f32 %v1266_v30  ;;  %1560 = vmatpush.bf16.msra.mxu0 %v1823_v8 }
 0x506   :  { %v1284_v34 = vmul.f32 %v1952_v26, %v1265_v41  ;;  %1953 = vrcp.f32 %v1267_v18  ;;  %vm1289_vm0 = vweird.f32 %v1952_v26  ;;  %v1324_v19 = vand.u32 2147483648, %v1267_v18  ;;  %vm1275_vm9 = vmor %vm1273_vm6, %vm1274_vm3 }
 0x507   :  { %1955 = vrcp.f32 %v1266_v30  ;;  %v1270_v46 = vsub.f32 1.0, %v1269_v35  ;;  %v1322_v37 = vand.u32 2147483647, %v1267_v18  ;;  %vm2562_vm4 = vmor %vm1288_vm2, %vm1289_vm0  ;;  %vm1318_vm5 = vweird.f32 %v1267_v18 }
 0x508   :  { %v1285_v39 = vsub.f32 1.0, %v1284_v34  ;;  %v1325_v7 = vor.u32 1.1754944e-38, %v1324_v19  ;;  %v1307_v32 = vand.u32 2147483647, %v1266_v30  ;;  %v1310_v20 = vor.u32 1.1754944e-38, %v1309_v33  ;;  %v1820_v19 = vld [vmem:[%s2628_s4 + $0x18] sm:$0xff] }
 0x509   :  { %v1271_v11 = vmul.f32 %v1950_v13, %v1270_v46  ;;  %vm1323_vm8 = vcmp.eq.f32.partialorder %v1322_v37, 8.507059e+37 }
 0x50a   :  { %v1286_v57 = vmul.f32 %v1952_v26, %v1285_v39  ;;  %vm1308_vm15 = vcmp.eq.f32.partialorder %v1307_v32, 8.507059e+37 }
 0x50b   :  { %v1272_v50 = vadd.f32 %v1950_v13, %v1271_v11 }
 0x50c   :  { %v1954_v51 = vpop.eup %1953  ;;  %v1287_v29 = vadd.f32 %v1952_v26, %v1286_v57  ;;  %v1821_v57 = vld [vmem:[%s2628_s4 + $0x20] sm:$0xff] }
 0x50d   :  { %v1314_v58 = vmul.f32 %v1954_v51, %v1267_v18  ;;  %v1956_v63 = vpop.eup %1955  ;;  %vm1319_vm1 = vweird.f32 %v1954_v51  ;;  %v1276_v28 = vsel %vm1275_vm9, %v1950_v13, %v1272_v50 }
 0x50e   :  { %v1299_v49 = vmul.f32 %v1956_v63, %v1266_v30  ;;  %vm1320_vm7 = vmor %vm1318_vm5, %vm1319_vm1  ;;  %v1291_v52 = vsel %vm2562_vm4, %v1952_v26, %v1287_v29  ;;  %v1281_v43 = vsel %vm1278_vm11, %v1280_v61, %v1276_v28  ;;  %vm1304_vm12 = vweird.f32 %v1956_v63 }
 0x50f   :  { %v1315_v12 = vsub.f32 1.0, %v1314_v58  ;;  %v1296_v24 = vsel %vm1293_vm10, %v1295_v5, %v1291_v52  ;;  %vm1305_vm14 = vmor %vm1303_vm13, %vm1304_vm12  ;;  %v1817_v52 = vld [vmem:[%s2628_s4] sm:$0xff] }
 0x510   :  { %v1300_v2 = vsub.f32 1.0, %v1299_v49  ;;  %v1330_v6 = vmul.f32 %v1296_v24, %v2551_v27  ;;  %v1340_v27 = vpop.permute.xlu1 %1339 }
 0x511   :  { %v1316_v31 = vmul.f32 %v1954_v51, %v1315_v12  ;;  %v1342_v3 = vmul.f32 %v1340_v27, %v2224_v53  ;;  %v1343_v4 = vmul.f32 %v1340_v27, %v2690_v9  ;;  %v1344_v39 = vmul.f32 %v1340_v27, %v2693_v45  ;;  %v1822_v9 = vld [vmem:[%s2628_s4 + $0x28] sm:$0xff] }
 0x512   :  { %v1301_v0 = vmul.f32 %v1956_v63, %v1300_v2  ;;  %v1345_v53 = vmul.f32 %v1340_v27, %v2694_v47  ;;  %1561 = vmatpush.bf16.msra.mxu0 %v1822_v9 }
 0x513   :  { %v1317_v56 = vadd.f32 %v1954_v51, %v1316_v31  ;;  %v1346_v13 = vadd.f32 %v1342_v3, %v2691_v17  ;;  %v1347_v18 = vadd.f32 %v1343_v4, %v2692_v22  ;;  %v1348_v17 = vadd.f32 %v1344_v39, %v2695_v59 }
 0x514   :  { %v1302_v16 = vadd.f32 %v1956_v63, %v1301_v0  ;;  %v1349_v22 = vadd.f32 %v1345_v53, %v2696_v10 }
 0x515   :  { %v1321_v1 = vsel %vm1320_vm7, %v1954_v51, %v1317_v56 }
 0x516   :  { %v1326_v55 = vsel %vm1323_vm8, %v1325_v7, %v1321_v1  ;;  %v1306_v25 = vsel %vm1305_vm14, %v1956_v63, %v1302_v16  ;;  %1562 = vmatpush.bf16.msra.mxu0 %v1821_v57 }
 0x517   :  { %v1328_v14 = vmul.f32 2.0, %v1326_v55  ;;  %v1311_v54 = vsel %vm1308_vm15, %v1310_v20, %v1306_v25 }
 0x519   :  { %v1746_v23 = vadd.f32 -1.0, %v1328_v14 }
 0x51a   :  { %1563 = vmatpush.bf16.msra.mxu0 %v1820_v19 }
 0x51b   :  { %v1331_v15 = vmul.f32 %v1746_v23, %v1281_v43 }
 0x51d   :  { %v2569_v36 = vadd.f32 %v1331_v15, %v1330_v6 }
 0x51e   :  { %1564 = vmatpush.bf16.msra.mxu0 %v1819_v44 }
 0x51f   :  { %1957 = vtanh.f32 %v2569_v36 }
 0x522   :  { %1565 = vmatpush.bf16.msra.mxu0 %v1818_v38 }
 0x525   :  { %v1958_v42 = vpop.eup %1957 }
 0x526   :  { %v1334_v21 = vmul.f32 %v1958_v42, %v1311_v54  ;;  %1566 = vmatpush.bf16.msra.mxu0 %v1817_v52 }
 0x528   :  { %v1350_v41 = vpack.c.bf16 %v1334_v21, %v1334_v21 }
 0x52a   :  { %1359 = vmatmul.bf16.vlgmr.msrb.gmra.mxu0 %v1350_v41  ;;  %1372 = vmatmul.bf16.vlgmr.msrb.gmra.mxu1 %v1350_v41 }
 0x52b   :  { %1385 = vmatmul.bf16.vlgmr.msrb.gmra.mxu2 %v1350_v41  ;;  %1398 = vmatmul.bf16.vlgmr.msrb.gmra.mxu3 %v1350_v41 }
 0x5a7   :  { %v1360_v26 = vpop.f32.mrf.mxu0  ;;  %v1373_v30 = vpop.f32.mrf.mxu1 }
 0x5a8   :  { %v1403_v34 = vadd.f32 %v1360_v26, %v1346_v13  ;;  %v1404_v35 = vadd.f32 %v1373_v30, %v1347_v18 }
 0x5aa   :  { %v1748_v46 = vmul.f32 -1.442695, %v1403_v34  ;;  %v1749_v51 = vmul.f32 -1.442695, %v1404_v35 }
 0x5ac   :  { %1959 = vpow2.f32 %v1748_v46 }
 0x5ad   :  { %1961 = vpow2.f32 %v1749_v51 }
 0x5ae   :  { %v1386_v45 = vpop.f32.mrf.mxu2  ;;  %v1399_v58 = vpop.f32.mrf.mxu3 }
 0x5af   :  { %v1405_v47 = vadd.f32 %v1386_v45, %v1348_v17  ;;  %v1406_v63 = vadd.f32 %v1399_v58, %v1349_v22  ;;  %v1362_v11 = vpop.f32.mrf.mxu0  ;;  %v1375_v12 = vpop.f32.mrf.mxu1 }
 0x5b1   :  { %v1750_v29 = vmul.f32 -1.442695, %v1405_v47  ;;  %v1751_v31 = vmul.f32 -1.442695, %v1406_v63 }
 0x5b2   :  { %v1960_v59 = vpop.eup %1959 }
 0x5b3   :  { %v1962_v37 = vpop.eup %1961  ;;  %v2595_v10 = vadd.f32 1.0, %v1960_v59  ;;  %1963 = vpow2.f32 %v1750_v29 }
 0x5b4   :  { %v1420_v48 = vadd.f32 1.0, %v1962_v37  ;;  %1965 = vpow2.f32 %v1751_v31 }
 0x5b5   :  { %1967 = vrcp.f32 %v2595_v10  ;;  %vm1428_vm6 = vweird.f32 %v2595_v10  ;;  %v1434_v27 = vand.u32 2147483648, %v2595_v10  ;;  %v1432_v3 = vand.u32 2147483647, %v2595_v10 }
 0x5b6   :  { %1969 = vrcp.f32 %v1420_v48  ;;  %v1388_v49 = vpop.f32.mrf.mxu2  ;;  %v1401_v50 = vpop.f32.mrf.mxu3  ;;  %vm1443_vm2 = vweird.f32 %v1420_v48  ;;  %v1447_v25 = vand.u32 2147483647, %v1420_v48  ;;  %v1449_v20 = vand.u32 2147483648, %v1420_v48 }
 0x5b7   :  { %v1435_v35 = vor.u32 1.1754944e-38, %v1434_v27  ;;  %vm1433_vm11 = vcmp.eq.f32.partialorder %v1432_v3, 8.507059e+37 }
 0x5b8   :  { %v1450_v13 = vor.u32 1.1754944e-38, %v1449_v20  ;;  %vm1448_vm10 = vcmp.eq.f32.partialorder %v1447_v25, 8.507059e+37 }
 0x5b9   :  { %v1964_v56 = vpop.eup %1963 }
 0x5ba   :  { %v1966_v40 = vpop.eup %1965  ;;  %v1421_v5 = vadd.f32 1.0, %v1964_v56 }
 0x5bb   :  { %v1968_v7 = vpop.eup %1967  ;;  %v1422_v60 = vadd.f32 1.0, %v1966_v40 }
 0x5bc   :  { %v1970_v1 = vpop.eup %1969  ;;  %v1424_v55 = vmul.f32 %v1968_v7, %v2595_v10  ;;  %vm1429_vm3 = vweird.f32 %v1968_v7  ;;  %v1464_v45 = vand.u32 2147483648, %v1421_v5  ;;  %vm1458_vm13 = vweird.f32 %v1421_v5 }
 0x5bd   :  { %v1439_v2 = vmul.f32 %v1970_v1, %v1420_v48  ;;  %1971 = vrcp.f32 %v1422_v60  ;;  %vm1444_vm0 = vweird.f32 %v1970_v1  ;;  %v1479_v15 = vand.u32 2147483648, %v1422_v60  ;;  %vm1430_vm9 = vmor %vm1428_vm6, %vm1429_vm3 }
 0x5be   :  { %1973 = vrcp.f32 %v1421_v5  ;;  %v1425_v14 = vsub.f32 1.0, %v1424_v55  ;;  %v1477_v32 = vand.u32 2147483647, %v1422_v60  ;;  %vm2608_vm4 = vmor %vm1443_vm2, %vm1444_vm0  ;;  %vm1473_vm5 = vweird.f32 %v1422_v60 }
 0x5bf   :  { %v1440_v28 = vsub.f32 1.0, %v1439_v2  ;;  %v1480_v62 = vor.u32 1.1754944e-38, %v1479_v15  ;;  %v1462_v58 = vand.u32 2147483647, %v1421_v5  ;;  %v1465_v63 = vor.u32 1.1754944e-38, %v1464_v45 }
 0x5c0   :  { %v1426_v0 = vmul.f32 %v1968_v7, %v1425_v14  ;;  %vm1478_vm8 = vcmp.eq.f32.partialorder %v1477_v32, 8.507059e+37 }
 0x5c1   :  { %v1441_v24 = vmul.f32 %v1970_v1, %v1440_v28  ;;  %vm1463_vm15 = vcmp.eq.f32.partialorder %v1462_v58, 8.507059e+37 }
 0x5c2   :  { %v1427_v54 = vadd.f32 %v1968_v7, %v1426_v0 }
 0x5c3   :  { %v1972_v61 = vpop.eup %1971  ;;  %v1442_v16 = vadd.f32 %v1970_v1, %v1441_v24 }
 0x5c4   :  { %v1469_v23 = vmul.f32 %v1972_v61, %v1422_v60  ;;  %v1974_v43 = vpop.eup %1973  ;;  %vm1474_vm1 = vweird.f32 %v1972_v61  ;;  %v1431_v30 = vsel %vm1430_vm9, %v1968_v7, %v1427_v54 }
 0x5c5   :  { %v1454_v42 = vmul.f32 %v1974_v43, %v1421_v5  ;;  %vm1475_vm7 = vmor %vm1473_vm5, %vm1474_vm1  ;;  %v1446_v4 = vsel %vm2608_vm4, %v1970_v1, %v1442_v16  ;;  %v1436_v9 = vsel %vm1433_vm11, %v1435_v35, %v1431_v30  ;;  %vm1459_vm12 = vweird.f32 %v1974_v43 }
 0x5c6   :  { %v1470_v6 = vsub.f32 1.0, %v1469_v23  ;;  %v1451_v39 = vsel %vm1448_vm10, %v1450_v13, %v1446_v4  ;;  %vm1460_vm14 = vmor %vm1458_vm13, %vm1459_vm12 }
 0x5c7   :  { %v1455_v18 = vsub.f32 1.0, %v1454_v42  ;;  %v1485_v51 = vmul.f32 %v1451_v39, %v2569_v36  ;;  %v1832_v36 = vld [vmem:[%s2629_s5] ss:$0 sm:$0xff] }
 0x5c8   :  { %v1471_v33 = vmul.f32 %v1972_v61, %v1470_v6 }
 0x5c9   :  { %v1456_v46 = vmul.f32 %v1974_v43, %v1455_v18 }
 0x5ca   :  { %v1472_v41 = vadd.f32 %v1972_v61, %v1471_v33 }
 0x5cb   :  { %v1457_v57 = vadd.f32 %v1974_v43, %v1456_v46 }
 0x5cc   :  { %v1476_v8 = vsel %vm1475_vm7, %v1972_v61, %v1472_v41 }
 0x5cd   :  { %v1481_v26 = vsel %vm1478_vm8, %v1480_v62, %v1476_v8  ;;  %v1461_v47 = vsel %vm1460_vm14, %v1974_v43, %v1457_v57 }
 0x5ce   :  { %v1483_v34 = vmul.f32 2.0, %v1481_v26  ;;  %v1466_v12 = vsel %vm1463_vm15, %v1465_v63, %v1461_v47 }
 0x5d0   :  { %v1752_v53 = vadd.f32 -1.0, %v1483_v34 }
 0x5d2   :  { %v1486_v17 = vmul.f32 %v1752_v53, %v1436_v9 }
 0x5d4   :  { %v1487_v22 = vadd.f32 %v1486_v17, %v1485_v51 }
 0x5d6   :  { %1975 = vtanh.f32 %v1487_v22 }
 0x5dc   :  { %v1976_v11 = vpop.eup %1975 }
 0x5dd   :  { %v1489_v19 = vmul.f32 %v1976_v11, %v1466_v12 }
 0x5df   :  { %v1490_v29 = vpack.c.bf16 %v1489_v19, %v1489_v19 }
 0x5e1   :  { %1567 = vmatmul.bf16.vlgmr.msra.gmra.mxu0 %v1490_v29 }
 0x65e   :  { %v1568_v31 = vpop.f32.mrf.mxu0 }
 0x65f   :  { %v1569_v59 = vadd.f32 %v1832_v36, %v1568_v31 }
 0x661   :  { %1572 = vst [vmem:[%s2630_s6] sm:$0xff] %v1569_v59 }
 0x666   :  { %v1570_v37 = vpop.f32.mrf.mxu0 }
 0x667   :  { %1577 = vsyncpa [#allocation4], 1 }

</bundles_post_ra>
